<compile_context>
chip_gen: v7x
topology: tpu7x:2x2x1
jax: 0.10.0
libtpu: 0.0.40
codegen_flags: <defaults>
</compile_context>

<pallas_src>
import numpy as np
import jax
import jax.numpy as jnp
from jax.experimental import pallas as pl
from jax.experimental.pallas import tpu as pltpu


# ---------------------------------------------------------------------------
# Pallas kernel: one grid step == Bb scenes.
#   grids_ref : (2, N)        row 0 = grid-cell center x, row 1 = grid-cell center y (f32)
#   geom_ref  : (Bb, M, 16)   [0:8]=box corners x0 y0 .. x3 y3, [8:10]=GT center xy,
#                             [10]=valid flag, [11:16]=padding (f32)
#   atten_ref : (Bb, N, K)    attention map in its NATIVE dtype (bf16/f16/f32)
#   out_ref   : (1, 1, 2)     [ sum over boxes of -(mean var over owned cells),
#                               number of boxes owning >= 1 grid cell ]
# TODO(synk): for production-scale N (query_res ~ 40x40+), add an "arbitrary" N-tiling grid
#             axis with running accumulators so the (Bb, M, N) working set stays bounded.
# ---------------------------------------------------------------------------
def _acl_kernel(grids_ref, geom_ref, atten_ref, out_ref):
    # ---- per-cell unbiased variance, reduced over K immediately (f32 math) ----
    a = atten_ref[...].astype(jnp.float32)        # (Bb, N, K) upcast on load
    bb, n, k = a.shape
    kdenom = max(k - 1, 1)                        # TODO(synk): torch.var is NaN for K==1
    mean = jnp.mean(a, axis=2, keepdims=True)     # (Bb, N, 1)
    d = a - mean
    varsum = jnp.sum(d * d, axis=2, keepdims=True) * (1.0 / kdenom)   # (Bb, N, 1)
    # `a` and `d` are dead from here on; only the (Bb, N, 1) per-cell variance stays live
    # through the mask/parity phase (cuts peak VMEM by ~one full attention block).

    # ---- unpack packed geometry (static value slices) ----
    geom = geom_ref[...]                          # (Bb, M, 16) f32
    m = geom.shape[1]
    c = geom[:, :, 0:8]                           # (Bb, M, 8) corners
    cen_x = geom[:, :, 8:9]                       # (Bb, M, 1)
    cen_y = geom[:, :, 9:10]
    valid = geom[:, :, 10:11]

    # Grid centers kept at (1, 1, N): broadcast happens sublane-replicated inside the VALU
    # ops instead of materializing (Bb, M, N) copies (lower vreg pressure).
    gx = grids_ref[0:1, :].reshape(1, 1, n)
    gy = grids_ref[1:2, :].reshape(1, 1, n)

    # ---- point-in-convex-polygon: cross products of the 4 edges share one sign ----
    # cross = (ex*cky - ey*ckx) - ex*gy + ey*gx, per-box constant hoisted to (Bb, M, 1).
    all_pos = jnp.ones((bb, m, n), dtype=jnp.bool_)
    all_neg = jnp.ones((bb, m, n), dtype=jnp.bool_)
    for kk in range(4):
        pp = (kk - 1) % 4
        ckx = c[:, :, 2 * kk:2 * kk + 1]
        cky = c[:, :, 2 * kk + 1:2 * kk + 2]
        cpx = c[:, :, 2 * pp:2 * pp + 1]
        cpy = c[:, :, 2 * pp + 1:2 * pp + 2]
        ex = ckx - cpx                            # (Bb, M, 1) edge vector
        ey = cky - cpy
        const = ex * cky - ey * ckx               # (Bb, M, 1) per-box constant
        cross = const - ex * gy + ey * gx         # (Bb, M, N)
        all_pos = all_pos & (cross > 0)
        all_neg = all_neg & (cross < 0)
    # TODO(synk): strict inequalities exclude cells that lie exactly on a box edge.
    inside = all_pos | all_neg

    # ---- always claim the grid cell closest to the GT center (first index on ties) ----
    # (evaluated after the polygon temporaries are dead to limit live (Bb, M, N) arrays)
    d2 = (gx - cen_x) ** 2 + (gy - cen_y) ** 2               # (Bb, M, N)
    d2min = jnp.min(d2, axis=2, keepdims=True)
    col = jax.lax.broadcasted_iota(jnp.int32, (bb, m, n), 2)
    first_min = jnp.min(jnp.where(d2 == d2min, col, n), axis=2, keepdims=True)
    closest = col == first_min

    pos_mask = (inside | closest) & (valid > 0.5)            # (Bb, M, N)

    # ---- overlap removal, parity-equivalent to the sequential torch toggle loop ----
    box_id = jax.lax.broadcasted_iota(jnp.int32, (bb, m, n), 1)
    claims = jnp.sum(pos_mask.astype(jnp.int32), axis=1, keepdims=True)   # (Bb, 1, N)
    last = jnp.max(jnp.where(pos_mask, box_id, -1), axis=1, keepdims=True)
    flag = jnp.where(jnp.bitwise_and(claims, 1) == 1, last, -1)           # (Bb, 1, N)

    # ---- per-box mean variance over the owned grid cells ----
    owned_f = (flag == box_id).astype(jnp.float32)           # (Bb, M, N)
    counts = jnp.sum(owned_f, axis=2, keepdims=True)         # (Bb, M, 1)
    # sum_n owned[m,n] * var[n] as a tiny (M, N) @ (N, 1) MXU contraction: N stays on the
    # LHS lanes / RHS sublanes, so no relayout of the (Bb, N, 1) variance vector is needed.
    msum = jnp.einsum('bmn,bnk->bmk', owned_f, varsum,
                      preferred_element_type=jnp.float32)    # (Bb, M, 1)
    mean_var = msum / jnp.maximum(counts, 1.0)
    has = (counts > 0.0).astype(jnp.float32)

    loss_s = -jnp.sum(mean_var * has)                        # scalar for this scene block
    cnt_s = jnp.sum(has)
    lane = jax.lax.broadcasted_iota(jnp.int32, (1, 1, 2), 2)
    out_ref[...] = jnp.where(lane == 0, loss_s, cnt_s)       # single merged store (8 B/step)


# ---------------------------------------------------------------------------
# Host-side glue: effective-box corners (tiny, O(M)) and the pallas_call wrapper
# ---------------------------------------------------------------------------
def effective_box_corners(boxes, dims_xy, grid_hw, ratio_min=1.0, ratio_max=6.0):
    """boxes: (..., 7) = [x, y, z, dx, dy, dz, yaw] -> flattened corners (..., 8)."""
    H, W = grid_hw
    cx, cy = boxes[..., 0], boxes[..., 1]
    dx, dy = boxes[..., 3], boxes[..., 4]
    ang = boxes[..., 6]
    rl = jnp.clip((dims_xy[0] / W) / dx, ratio_min, ratio_max)
    rw = jnp.clip((dims_xy[1] / H) / dy, ratio_min, ratio_max)
    ex, ey = dx * rl, dy * rw
    # clockwise corner order, origin = 0.5 (matches center_to_corner_box2d)
    corners_norm = jnp.array(
        [[-0.5, -0.5], [-0.5, 0.5], [0.5, 0.5], [0.5, -0.5]], jnp.float32)
    local = corners_norm * jnp.stack([ex, ey], axis=-1)[..., None, :]      # (...,4,2)
    cos, sin = jnp.cos(ang)[..., None], jnp.sin(ang)[..., None]
    lx, ly = local[..., 0], local[..., 1]
    rx = lx * cos + ly * sin          # rotation_2d: clockwise for positive angle
    ry = -lx * sin + ly * cos
    corners = jnp.stack([rx, ry], axis=-1) + jnp.stack([cx, cy], -1)[..., None, :]
    return corners.reshape(*boxes.shape[:-1], 8)


def _vmem_budget_bytes():
    """Generation-aware working-set budget: v7x has 64 MiB VMEM per TC, v5e/v6e 128 MiB."""
    try:
        kind = jax.devices()[0].device_kind.lower()
    except Exception:
        kind = ""
    if "v7" in kind:
        return 24 << 20
    return 40 << 20


def _pick_scenes_per_step(B, N, K, M, atten_itemsize):
    """Scenes per grid step from an honest per-scene VMEM model (not just the input DMA):
    double-buffered native-dtype attention block + in-kernel f32 upcast & centered copy +
    ~8 live (M, N) f32/int32 mask intermediates + double-buffered geometry block."""
    budget = _vmem_budget_bytes()
    per_scene = (2 * N * K * atten_itemsize      # pipelined attention input buffers
                 + 2 * N * K * 4                 # in-kernel f32 `a` and `d`
                 + 8 * M * N * 4                 # (M, N) mask-phase temporaries
                 + 2 * M * 16 * 4)               # geometry double-buffer
    bb = max(1, budget // max(per_scene, 1))
    if B >= 2:
        bb = min(bb, -(-B // 2))                 # >= 2 grid steps so v7x's 2 TCs both get work
    return int(min(B, bb))


def attention_constrained_loss(atten_map, corners8, centers, valid, grids,
                               scenes_per_step=None):
    """atten_map: (B, N, K) in its native dtype; corners8: (B, M, 8); centers: (B, M, 2);
       valid: (B, M, 1); grids: (2, N)."""
    B, N, K = atten_map.shape
    M = corners8.shape[1]
    Bb = scenes_per_step or _pick_scenes_per_step(B, N, K, M, atten_map.dtype.itemsize)
    S = -(-B // Bb)
    Bp = S * Bb
    if Bp != B:          # pad with invalid scenes: they contribute 0 loss and 0 count
        pad = Bp - B
        atten_map = jnp.pad(atten_map, ((0, pad), (0, 0), (0, 0)))
        corners8 = jnp.pad(corners8, ((0, pad), (0, 0), (0, 0)))
        centers = jnp.pad(centers, ((0, pad), (0, 0), (0, 0)))
        valid = jnp.pad(valid, ((0, pad), (0, 0), (0, 0)))

    # Pack the tiny per-scene geometry tensors into one (B, M, 16) array -> 1 DMA/step.
    # TODO(synk): if M grows, flatten to (B, M*16) for a lane-dense (128-multiple) layout.
    geom = jnp.concatenate(
        [corners8.astype(jnp.float32), centers.astype(jnp.float32),
         valid.astype(jnp.float32), jnp.zeros((Bp, M, 5), jnp.float32)], axis=-1)

    vmem_limit = int(min(_vmem_budget_bytes() + (16 << 20), 56 << 20))

    out = pl.pallas_call(
        _acl_kernel,
        out_shape=jax.ShapeDtypeStruct((S, 1, 2), jnp.float32),
        grid_spec=pltpu.PrefetchScalarGridSpec(
            num_scalar_prefetch=0,
            grid=(S,),
            in_specs=[
                pl.BlockSpec((2, N), lambda s: (0, 0)),           # constant block: DMA'd once
                pl.BlockSpec((Bb, M, 16), lambda s: (s, 0, 0)),   # packed geometry
                pl.BlockSpec((Bb, N, K), lambda s: (s, 0, 0)),    # attention, native dtype/layout
            ],
            out_specs=pl.BlockSpec((1, 1, 2), lambda s: (s, 0, 0)),
        ),
        compiler_params=pltpu.CompilerParams(
            dimension_semantics=("parallel",),                    # independent scene blocks
            vmem_limit_bytes=vmem_limit),
    )(grids.astype(jnp.float32), geom, atten_map)                 # NO host cast of atten_map

    var_loss = jnp.sum(out[:, 0, 0])
    var_pos_num = jnp.maximum(jnp.sum(out[:, 0, 1]), 1.0)
    return var_loss / var_pos_num                 # (loss_weight not applied in reference forward)


# ---------------------------------------------------------------------------
# Numpy reference: faithful port of the ORIGINAL sequential mmdet3d loop
# (temp_grid_flag toggling), so the kernel's parity reformulation is validated
# independently, not against itself.  The edge cross product uses the same
# algebraically-identical rearrangement as the kernel for bit-consistency
# (only matters for cells exactly on a box edge).
# ---------------------------------------------------------------------------
def reference_loss(atten, corners8, centers, num_boxes, grids):
    atten, corners8 = np.asarray(atten), np.asarray(corners8)
    centers, grids = np.asarray(centers), np.asarray(grids)
    B = corners8.shape[0]
    N = grids.shape[1]
    gx, gy = grids[0], grids[1]
    tot_l, tot_c = 0.0, 0.0
    for b in range(B):
        nb = int(num_boxes[b])
        if nb == 0:
            continue
        temp_flag = -np.ones(N, dtype=np.int64)
        c, cen = corners8[b], centers[b]
        for i in range(nb):
            all_pos = np.ones(N, bool)
            all_neg = np.ones(N, bool)
            for kk in range(4):
                pp = (kk - 1) % 4
                ckx, cky = c[i, 2 * kk], c[i, 2 * kk + 1]
                cpx, cpy = c[i, 2 * pp], c[i, 2 * pp + 1]
                ex, ey = ckx - cpx, cky - cpy
                const = ex * cky - ey * ckx
                cross = const - ex * gy + ey * gx
                all_pos &= cross > 0
                all_neg &= cross < 0
            inside = all_pos | all_neg
            pos_ind = np.nonzero(inside)[0]
            d2 = (gx - cen[i, 0]) ** 2 + (gy - cen[i, 1]) ** 2
            min_ind = int(np.argmin(d2))
            if min_ind not in pos_ind:
                pos_ind = np.concatenate([pos_ind, np.array([min_ind])])
            if len(pos_ind):
                if not (temp_flag[pos_ind] == -1).all():
                    keep = []
                    for p in pos_ind:
                        if temp_flag[p] == -1:
                            keep.append(int(p))
                        else:
                            temp_flag[p] = -1
                    pos_ind = np.array(keep, dtype=np.int64)
                if len(pos_ind):
                    temp_flag[pos_ind] = i
        a = atten[b].astype(np.float64)           # (N, K)
        for i in range(nb):
            grid_ind = np.nonzero(temp_flag == i)[0]
            if len(grid_ind) > 0:
                var = a[grid_ind, :].var(axis=1, ddof=1).mean()
                tot_l += -var
                tot_c += 1.0
    return tot_l / max(tot_c, 1.0)


# ---------------------------------------------------------------------------
if __name__ == "__main__":
    # Module config at small shapes: query_res = [8, 16] -> N = 128 grid cells
    H, W = 8, 16
    N = H * W
    K = 64                        # attention width per query cell
    B = 4                         # scenes
    M = 8                         # padded max GT boxes per scene
    num_boxes = [5, 3, 6, 0]      # actual boxes per scene (one empty scene)
    pc_range = np.array([-51.2, -51.2, -5.0, 51.2, 51.2, 3.0], np.float32)
    dims = pc_range[3:] - pc_range[:3]            # [102.4, 102.4, 8.0]

    # Grid-cell centers in sensor coordinates (matches grids_sensor in __init__)
    ww, hh = np.meshgrid(np.arange(W), np.arange(H))
    ww = ww.reshape(-1).astype(np.float32) + 0.5
    hh = hh.reshape(-1).astype(np.float32) + 0.5
    gxs = ww / W * dims[0] + pc_range[0]
    gys = hh / H * dims[1] + pc_range[1]
    grids = jnp.asarray(np.stack([gxs, gys], axis=0))        # (2, N)

    # Deterministic synthetic inputs
    key = jax.random.PRNGKey(0)
    k_att, k_c, k_z, k_d, k_y = jax.random.split(key, 5)
    atten_map = jax.random.normal(k_att, (B, N, K), jnp.float32)

    cxy = jax.random.uniform(k_c, (B, M, 2), jnp.float32, -40.0, 40.0)
    cz = jax.random.uniform(k_z, (B, M, 1), jnp.float32, -3.0, 1.0)
    whl = jax.random.uniform(k_d, (B, M, 3), jnp.float32, 1.5, 8.0)
    yaw = jax.random.uniform(k_y, (B, M, 1), jnp.float32, -np.pi, np.pi)
    gt_pad = jnp.concatenate([cxy, cz, whl, yaw], axis=-1)   # (B, M, 7)

    valid_np = np.zeros((B, M, 1), np.float32)
    for b in range(B):
        valid_np[b, :num_boxes[b], 0] = 1.0
    valid = jnp.asarray(valid_np)

    corners8 = effective_box_corners(gt_pad, dims, (H, W))   # (B, M, 8)
    centers = gt_pad[..., :2]                                 # (B, M, 2)

    # 1) f32 attention map, explicit 2-scene blocks (exercises the S=2 pipelined grid)
    loss = attention_constrained_loss(atten_map, corners8, centers, valid, grids,
                                      scenes_per_step=2)
    loss = jax.block_until_ready(loss)
    ref = reference_loss(atten_map, corners8, centers, num_boxes, grids)
    np.testing.assert_allclose(np.asarray(loss), ref, rtol=1e-4, atol=1e-5)

    # 2) bf16 attention map in its NATIVE dtype (no host f32 cast), auto block sizing
    atten_bf16 = atten_map.astype(jnp.bfloat16)
    loss_bf = attention_constrained_loss(atten_bf16, corners8, centers, valid, grids)
    loss_bf = jax.block_until_ready(loss_bf)
    ref_bf = reference_loss(np.asarray(atten_bf16).astype(np.float32),
                            corners8, centers, num_boxes, grids)
    np.testing.assert_allclose(np.asarray(loss_bf), ref_bf, rtol=1e-3, atol=1e-4)

    print("KERNEL_OK")
</pallas_src>

<mosaic_0001>
module attributes {stable_mosaic.version = 11 : i64} {
  func.func @_acl_kernel(%arg0: i32, %arg1: memref<2x128xf32, #tpu.memory_space<vmem>>, %arg2: memref<2x8x16xf32, #tpu.memory_space<vmem>>, %arg3: memref<2x128x64xf32, #tpu.memory_space<vmem>>, %arg4: memref<1x1x2xf32, #tpu.memory_space<vmem>>) attributes {dimension_semantics = [#tpu.dimension_semantics<parallel>], iteration_bounds = array<i64: 2>, scalar_prefetch = 0 : i64, scratch_operands = 0 : i64, tpu.core_type = #tpu.core_type<tc>, window_params = [{pipeline_mode = #tpu.pipeline_mode<synchronous>, transform_indices = @transform_0, window_bounds = array<i64: 2, 128>}, {transform_indices = @transform_1, window_bounds = array<i64: 2, 8, 16>}, {transform_indices = @transform_2, window_bounds = array<i64: 2, 128, 64>}, {transform_indices = @transform_3, window_bounds = array<i64: 1, 1, 2>}]} {
    %c0 = arith.constant 0 : index
    %c0_0 = arith.constant 0 : index
    %c0_1 = arith.constant 0 : index
    %0 = vector.load %arg3[%c0, %c0_0, %c0_1] : memref<2x128x64xf32, #tpu.memory_space<vmem>>, vector<2x128x64xf32>
    %cst = arith.constant dense<0.000000e+00> : vector<2x128xf32>
    %1 = vector.multi_reduction <add>, %0, %cst [2] : vector<2x128x64xf32> to vector<2x128xf32>
    %2 = vector.shape_cast %1 : vector<2x128xf32> to vector<2x128x1xf32>
    %cst_2 = arith.constant 6.400000e+01 : f32
    %3 = vector.broadcast %cst_2 : f32 to vector<2x128x1xf32>
    %4 = arith.divf %2, %3 : vector<2x128x1xf32>
    %5 = vector.broadcast %4 : vector<2x128x1xf32> to vector<2x128x64xf32>
    %6 = arith.subf %0, %5 : vector<2x128x64xf32>
    %7 = arith.mulf %6, %6 : vector<2x128x64xf32>
    %cst_3 = arith.constant dense<0.000000e+00> : vector<2x128xf32>
    %8 = vector.multi_reduction <add>, %7, %cst_3 [2] : vector<2x128x64xf32> to vector<2x128xf32>
    %9 = vector.shape_cast %8 : vector<2x128xf32> to vector<2x128x1xf32>
    %cst_4 = arith.constant 0.0158730168 : f32
    %10 = vector.broadcast %cst_4 : f32 to vector<2x128x1xf32>
    %11 = arith.mulf %9, %10 : vector<2x128x1xf32>
    %c0_5 = arith.constant 0 : index
    %c0_6 = arith.constant 0 : index
    %c0_7 = arith.constant 0 : index
    %12 = vector.load %arg2[%c0_5, %c0_6, %c0_7] : memref<2x8x16xf32, #tpu.memory_space<vmem>>, vector<2x8x16xf32>
    %13 = vector.extract_strided_slice %12 {offsets = [0, 0, 0], sizes = [2, 8, 8], strides = [1, 1, 1]} : vector<2x8x16xf32> to vector<2x8x8xf32>
    %14 = vector.extract_strided_slice %12 {offsets = [0, 0, 8], sizes = [2, 8, 1], strides = [1, 1, 1]} : vector<2x8x16xf32> to vector<2x8x1xf32>
    %15 = vector.extract_strided_slice %12 {offsets = [0, 0, 9], sizes = [2, 8, 1], strides = [1, 1, 1]} : vector<2x8x16xf32> to vector<2x8x1xf32>
    %16 = vector.extract_strided_slice %12 {offsets = [0, 0, 10], sizes = [2, 8, 1], strides = [1, 1, 1]} : vector<2x8x16xf32> to vector<2x8x1xf32>
    %c0_8 = arith.constant 0 : index
    %c0_9 = arith.constant 0 : index
    %17 = vector.load %arg1[%c0_8, %c0_9] : memref<2x128xf32, #tpu.memory_space<vmem>>, vector<1x128xf32>
    %18 = vector.shape_cast %17 : vector<1x128xf32> to vector<1x1x128xf32>
    %c1 = arith.constant 1 : index
    %c0_10 = arith.constant 0 : index
    %19 = vector.load %arg1[%c1, %c0_10] : memref<2x128xf32, #tpu.memory_space<vmem>>, vector<1x128xf32>
    %20 = vector.shape_cast %19 : vector<1x128xf32> to vector<1x1x128xf32>
    %true = arith.constant true
    %21 = vector.broadcast %true : i1 to vector<2x8x128xi1>
    %true_11 = arith.constant true
    %22 = vector.broadcast %true_11 : i1 to vector<2x8x128xi1>
    %23 = vector.extract_strided_slice %13 {offsets = [0, 0, 0], sizes = [2, 8, 1], strides = [1, 1, 1]} : vector<2x8x8xf32> to vector<2x8x1xf32>
    %24 = vector.extract_strided_slice %13 {offsets = [0, 0, 1], sizes = [2, 8, 1], strides = [1, 1, 1]} : vector<2x8x8xf32> to vector<2x8x1xf32>
    %25 = vector.extract_strided_slice %13 {offsets = [0, 0, 6], sizes = [2, 8, 1], strides = [1, 1, 1]} : vector<2x8x8xf32> to vector<2x8x1xf32>
    %26 = vector.extract_strided_slice %13 {offsets = [0, 0, 7], sizes = [2, 8, 1], strides = [1, 1, 1]} : vector<2x8x8xf32> to vector<2x8x1xf32>
    %27 = arith.subf %23, %25 : vector<2x8x1xf32>
    %28 = arith.subf %24, %26 : vector<2x8x1xf32>
    %29 = arith.mulf %27, %24 : vector<2x8x1xf32>
    %30 = arith.mulf %28, %23 : vector<2x8x1xf32>
    %31 = arith.subf %29, %30 : vector<2x8x1xf32>
    %32 = vector.broadcast %27 : vector<2x8x1xf32> to vector<2x8x128xf32>
    %33 = vector.broadcast %20 : vector<1x1x128xf32> to vector<2x8x128xf32>
    %34 = arith.mulf %32, %33 : vector<2x8x128xf32>
    %35 = vector.broadcast %31 : vector<2x8x1xf32> to vector<2x8x128xf32>
    %36 = arith.subf %35, %34 : vector<2x8x128xf32>
    %37 = vector.broadcast %28 : vector<2x8x1xf32> to vector<2x8x128xf32>
    %38 = vector.broadcast %18 : vector<1x1x128xf32> to vector<2x8x128xf32>
    %39 = arith.mulf %37, %38 : vector<2x8x128xf32>
    %40 = arith.addf %36, %39 : vector<2x8x128xf32>
    %cst_12 = arith.constant 0.000000e+00 : f32
    %41 = vector.broadcast %cst_12 : f32 to vector<2x8x128xf32>
    %42 = arith.cmpf ogt, %40, %41 : vector<2x8x128xf32>
    %43 = arith.andi %21, %42 : vector<2x8x128xi1>
    %cst_13 = arith.constant 0.000000e+00 : f32
    %44 = vector.broadcast %cst_13 : f32 to vector<2x8x128xf32>
    %45 = arith.cmpf olt, %40, %44 : vector<2x8x128xf32>
    %46 = arith.andi %22, %45 : vector<2x8x128xi1>
    %47 = vector.extract_strided_slice %13 {offsets = [0, 0, 2], sizes = [2, 8, 1], strides = [1, 1, 1]} : vector<2x8x8xf32> to vector<2x8x1xf32>
    %48 = vector.extract_strided_slice %13 {offsets = [0, 0, 3], sizes = [2, 8, 1], strides = [1, 1, 1]} : vector<2x8x8xf32> to vector<2x8x1xf32>
    %49 = vector.extract_strided_slice %13 {offsets = [0, 0, 0], sizes = [2, 8, 1], strides = [1, 1, 1]} : vector<2x8x8xf32> to vector<2x8x1xf32>
    %50 = vector.extract_strided_slice %13 {offsets = [0, 0, 1], sizes = [2, 8, 1], strides = [1, 1, 1]} : vector<2x8x8xf32> to vector<2x8x1xf32>
    %51 = arith.subf %47, %49 : vector<2x8x1xf32>
    %52 = arith.subf %48, %50 : vector<2x8x1xf32>
    %53 = arith.mulf %51, %48 : vector<2x8x1xf32>
    %54 = arith.mulf %52, %47 : vector<2x8x1xf32>
    %55 = arith.subf %53, %54 : vector<2x8x1xf32>
    %56 = vector.broadcast %51 : vector<2x8x1xf32> to vector<2x8x128xf32>
    %57 = vector.broadcast %20 : vector<1x1x128xf32> to vector<2x8x128xf32>
    %58 = arith.mulf %56, %57 : vector<2x8x128xf32>
    %59 = vector.broadcast %55 : vector<2x8x1xf32> to vector<2x8x128xf32>
    %60 = arith.subf %59, %58 : vector<2x8x128xf32>
    %61 = vector.broadcast %52 : vector<2x8x1xf32> to vector<2x8x128xf32>
    %62 = vector.broadcast %18 : vector<1x1x128xf32> to vector<2x8x128xf32>
    %63 = arith.mulf %61, %62 : vector<2x8x128xf32>
    %64 = arith.addf %60, %63 : vector<2x8x128xf32>
    %cst_14 = arith.constant 0.000000e+00 : f32
    %65 = vector.broadcast %cst_14 : f32 to vector<2x8x128xf32>
    %66 = arith.cmpf ogt, %64, %65 : vector<2x8x128xf32>
    %67 = arith.andi %43, %66 : vector<2x8x128xi1>
    %cst_15 = arith.constant 0.000000e+00 : f32
    %68 = vector.broadcast %cst_15 : f32 to vector<2x8x128xf32>
    %69 = arith.cmpf olt, %64, %68 : vector<2x8x128xf32>
    %70 = arith.andi %46, %69 : vector<2x8x128xi1>
    %71 = vector.extract_strided_slice %13 {offsets = [0, 0, 4], sizes = [2, 8, 1], strides = [1, 1, 1]} : vector<2x8x8xf32> to vector<2x8x1xf32>
    %72 = vector.extract_strided_slice %13 {offsets = [0, 0, 5], sizes = [2, 8, 1], strides = [1, 1, 1]} : vector<2x8x8xf32> to vector<2x8x1xf32>
    %73 = vector.extract_strided_slice %13 {offsets = [0, 0, 2], sizes = [2, 8, 1], strides = [1, 1, 1]} : vector<2x8x8xf32> to vector<2x8x1xf32>
    %74 = vector.extract_strided_slice %13 {offsets = [0, 0, 3], sizes = [2, 8, 1], strides = [1, 1, 1]} : vector<2x8x8xf32> to vector<2x8x1xf32>
    %75 = arith.subf %71, %73 : vector<2x8x1xf32>
    %76 = arith.subf %72, %74 : vector<2x8x1xf32>
    %77 = arith.mulf %75, %72 : vector<2x8x1xf32>
    %78 = arith.mulf %76, %71 : vector<2x8x1xf32>
    %79 = arith.subf %77, %78 : vector<2x8x1xf32>
    %80 = vector.broadcast %75 : vector<2x8x1xf32> to vector<2x8x128xf32>
    %81 = vector.broadcast %20 : vector<1x1x128xf32> to vector<2x8x128xf32>
    %82 = arith.mulf %80, %81 : vector<2x8x128xf32>
    %83 = vector.broadcast %79 : vector<2x8x1xf32> to vector<2x8x128xf32>
    %84 = arith.subf %83, %82 : vector<2x8x128xf32>
    %85 = vector.broadcast %76 : vector<2x8x1xf32> to vector<2x8x128xf32>
    %86 = vector.broadcast %18 : vector<1x1x128xf32> to vector<2x8x128xf32>
    %87 = arith.mulf %85, %86 : vector<2x8x128xf32>
    %88 = arith.addf %84, %87 : vector<2x8x128xf32>
    %cst_16 = arith.constant 0.000000e+00 : f32
    %89 = vector.broadcast %cst_16 : f32 to vector<2x8x128xf32>
    %90 = arith.cmpf ogt, %88, %89 : vector<2x8x128xf32>
    %91 = arith.andi %67, %90 : vector<2x8x128xi1>
    %cst_17 = arith.constant 0.000000e+00 : f32
    %92 = vector.broadcast %cst_17 : f32 to vector<2x8x128xf32>
    %93 = arith.cmpf olt, %88, %92 : vector<2x8x128xf32>
    %94 = arith.andi %70, %93 : vector<2x8x128xi1>
    %95 = vector.extract_strided_slice %13 {offsets = [0, 0, 6], sizes = [2, 8, 1], strides = [1, 1, 1]} : vector<2x8x8xf32> to vector<2x8x1xf32>
    %96 = vector.extract_strided_slice %13 {offsets = [0, 0, 7], sizes = [2, 8, 1], strides = [1, 1, 1]} : vector<2x8x8xf32> to vector<2x8x1xf32>
    %97 = vector.extract_strided_slice %13 {offsets = [0, 0, 4], sizes = [2, 8, 1], strides = [1, 1, 1]} : vector<2x8x8xf32> to vector<2x8x1xf32>
    %98 = vector.extract_strided_slice %13 {offsets = [0, 0, 5], sizes = [2, 8, 1], strides = [1, 1, 1]} : vector<2x8x8xf32> to vector<2x8x1xf32>
    %99 = arith.subf %95, %97 : vector<2x8x1xf32>
    %100 = arith.subf %96, %98 : vector<2x8x1xf32>
    %101 = arith.mulf %99, %96 : vector<2x8x1xf32>
    %102 = arith.mulf %100, %95 : vector<2x8x1xf32>
    %103 = arith.subf %101, %102 : vector<2x8x1xf32>
    %104 = vector.broadcast %99 : vector<2x8x1xf32> to vector<2x8x128xf32>
    %105 = vector.broadcast %20 : vector<1x1x128xf32> to vector<2x8x128xf32>
    %106 = arith.mulf %104, %105 : vector<2x8x128xf32>
    %107 = vector.broadcast %103 : vector<2x8x1xf32> to vector<2x8x128xf32>
    %108 = arith.subf %107, %106 : vector<2x8x128xf32>
    %109 = vector.broadcast %100 : vector<2x8x1xf32> to vector<2x8x128xf32>
    %110 = vector.broadcast %18 : vector<1x1x128xf32> to vector<2x8x128xf32>
    %111 = arith.mulf %109, %110 : vector<2x8x128xf32>
    %112 = arith.addf %108, %111 : vector<2x8x128xf32>
    %cst_18 = arith.constant 0.000000e+00 : f32
    %113 = vector.broadcast %cst_18 : f32 to vector<2x8x128xf32>
    %114 = arith.cmpf ogt, %112, %113 : vector<2x8x128xf32>
    %115 = arith.andi %91, %114 : vector<2x8x128xi1>
    %cst_19 = arith.constant 0.000000e+00 : f32
    %116 = vector.broadcast %cst_19 : f32 to vector<2x8x128xf32>
    %117 = arith.cmpf olt, %112, %116 : vector<2x8x128xf32>
    %118 = arith.andi %94, %117 : vector<2x8x128xi1>
    %119 = arith.ori %115, %118 : vector<2x8x128xi1>
    %120 = vector.broadcast %18 : vector<1x1x128xf32> to vector<2x8x128xf32>
    %121 = vector.broadcast %14 : vector<2x8x1xf32> to vector<2x8x128xf32>
    %122 = arith.subf %120, %121 : vector<2x8x128xf32>
    %123 = arith.mulf %122, %122 : vector<2x8x128xf32>
    %124 = vector.broadcast %20 : vector<1x1x128xf32> to vector<2x8x128xf32>
    %125 = vector.broadcast %15 : vector<2x8x1xf32> to vector<2x8x128xf32>
    %126 = arith.subf %124, %125 : vector<2x8x128xf32>
    %127 = arith.mulf %126, %126 : vector<2x8x128xf32>
    %128 = arith.addf %123, %127 : vector<2x8x128xf32>
    %cst_20 = arith.constant dense<0x7F800000> : vector<2x8xf32>
    %129 = vector.multi_reduction <minimumf>, %128, %cst_20 [2] : vector<2x8x128xf32> to vector<2x8xf32>
    %130 = vector.shape_cast %129 : vector<2x8xf32> to vector<2x8x1xf32>
    %131 = tpu.iota {dimensions = array<i32: 2>} : vector<2x8x128xi32>
    %132 = vector.broadcast %130 : vector<2x8x1xf32> to vector<2x8x128xf32>
    %133 = arith.cmpf oeq, %128, %132 : vector<2x8x128xf32>
    %c128_i32 = arith.constant 128 : i32
    %134 = vector.broadcast %c128_i32 : i32 to vector<2x8x128xi32>
    %135 = arith.select %133, %131, %134 : vector<2x8x128xi1>, vector<2x8x128xi32>
    %cst_21 = arith.constant dense<2147483647> : vector<2x8xi32>
    %136 = vector.multi_reduction <minsi>, %135, %cst_21 [2] : vector<2x8x128xi32> to vector<2x8xi32>
    %137 = vector.shape_cast %136 : vector<2x8xi32> to vector<2x8x1xi32>
    %138 = vector.broadcast %137 : vector<2x8x1xi32> to vector<2x8x128xi32>
    %139 = arith.cmpi eq, %131, %138 : vector<2x8x128xi32>
    %140 = arith.ori %119, %139 : vector<2x8x128xi1>
    %cst_22 = arith.constant 5.000000e-01 : f32
    %141 = vector.broadcast %cst_22 : f32 to vector<2x8x1xf32>
    %142 = arith.cmpf ogt, %16, %141 : vector<2x8x1xf32>
    %143 = vector.broadcast %142 : vector<2x8x1xi1> to vector<2x8x128xi1>
    %144 = arith.andi %140, %143 : vector<2x8x128xi1>
    %145 = tpu.iota {dimensions = array<i32: 1>} : vector<2x8x128xi32>
    %146 = arith.extui %144 : vector<2x8x128xi1> to vector<2x8x128xi32>
    %cst_23 = arith.constant dense<0> : vector<2x128xi32>
    %147 = vector.multi_reduction <add>, %146, %cst_23 [1] : vector<2x8x128xi32> to vector<2x128xi32>
    %148 = vector.shape_cast %147 : vector<2x128xi32> to vector<2x1x128xi32>
    %c-1_i32 = arith.constant -1 : i32
    %149 = vector.broadcast %c-1_i32 : i32 to vector<2x8x128xi32>
    %150 = arith.select %144, %145, %149 : vector<2x8x128xi1>, vector<2x8x128xi32>
    %cst_24 = arith.constant dense<-2147483648> : vector<2x128xi32>
    %151 = vector.multi_reduction <maxsi>, %150, %cst_24 [1] : vector<2x8x128xi32> to vector<2x128xi32>
    %152 = vector.shape_cast %151 : vector<2x128xi32> to vector<2x1x128xi32>
    %c1_i32 = arith.constant 1 : i32
    %153 = vector.broadcast %c1_i32 : i32 to vector<2x1x128xi32>
    %154 = arith.andi %148, %153 : vector<2x1x128xi32>
    %c1_i32_25 = arith.constant 1 : i32
    %155 = vector.broadcast %c1_i32_25 : i32 to vector<2x1x128xi32>
    %156 = arith.cmpi eq, %154, %155 : vector<2x1x128xi32>
    %c-1_i32_26 = arith.constant -1 : i32
    %157 = vector.broadcast %c-1_i32_26 : i32 to vector<2x1x128xi32>
    %158 = arith.select %156, %152, %157 : vector<2x1x128xi1>, vector<2x1x128xi32>
    %159 = vector.broadcast %158 : vector<2x1x128xi32> to vector<2x8x128xi32>
    %160 = arith.cmpi eq, %159, %145 : vector<2x8x128xi32>
    %161 = arith.extui %160 : vector<2x8x128xi1> to vector<2x8x128xi32>
    %162 = arith.sitofp %161 : vector<2x8x128xi32> to vector<2x8x128xf32>
    %cst_27 = arith.constant dense<0.000000e+00> : vector<2x8xf32>
    %163 = vector.multi_reduction <add>, %162, %cst_27 [2] : vector<2x8x128xf32> to vector<2x8xf32>
    %164 = vector.shape_cast %163 : vector<2x8xf32> to vector<2x8x1xf32>
    "tpu.trace_start"() <{level = 10 : i32, message = "bmn,bnk->bmk"}> : () -> ()
    %cst_28 = arith.constant dense<0.000000e+00> : vector<2x8x1xf32>
    %165 = tpu.matmul %162, %11, %cst_28 {dimension_numbers = #tpu.dot_dimension_numbers<[2], [1], [1], [2], [0, 0, 0, 1, 1, 2], [0], [0]>} : vector<2x8x128xf32>, vector<2x128x1xf32>, vector<2x8x1xf32> -> vector<2x8x1xf32>
    "tpu.trace_stop"() : () -> ()
    %cst_29 = arith.constant 1.000000e+00 : f32
    %166 = vector.broadcast %cst_29 : f32 to vector<2x8x1xf32>
    %167 = arith.maximumf %164, %166 : vector<2x8x1xf32>
    %168 = arith.divf %165, %167 : vector<2x8x1xf32>
    %cst_30 = arith.constant 0.000000e+00 : f32
    %169 = vector.broadcast %cst_30 : f32 to vector<2x8x1xf32>
    %170 = arith.cmpf ogt, %164, %169 : vector<2x8x1xf32>
    %171 = arith.extui %170 : vector<2x8x1xi1> to vector<2x8x1xi32>
    %172 = arith.sitofp %171 : vector<2x8x1xi32> to vector<2x8x1xf32>
    %173 = arith.mulf %168, %172 : vector<2x8x1xf32>
    %174 = vector.shape_cast %173 : vector<2x8x1xf32> to vector<1x2x8x1xf32>
    %cst_31 = arith.constant dense<0.000000e+00> : vector<1xf32>
    %175 = vector.multi_reduction <add>, %174, %cst_31 [1, 2, 3] : vector<1x2x8x1xf32> to vector<1xf32>
    %176 = vector.shape_cast %175 : vector<1xf32> to vector<1x1x1x1xf32>
    %177 = vector.extract %176[0, 0, 0, 0] : f32 from vector<1x1x1x1xf32>
    %cst_32 = arith.constant 0.000000e+00 : f32
    %178 = arith.subf %cst_32, %177 : f32
    %179 = vector.shape_cast %172 : vector<2x8x1xf32> to vector<1x2x8x1xf32>
    %cst_33 = arith.constant dense<0.000000e+00> : vector<1xf32>
    %180 = vector.multi_reduction <add>, %179, %cst_33 [1, 2, 3] : vector<1x2x8x1xf32> to vector<1xf32>
    %181 = vector.shape_cast %180 : vector<1xf32> to vector<1x1x1x1xf32>
    %182 = vector.extract %181[0, 0, 0, 0] : f32 from vector<1x1x1x1xf32>
    %183 = tpu.iota {dimensions = array<i32: 2>} : vector<1x1x2xi32>
    %c0_i32 = arith.constant 0 : i32
    %184 = vector.broadcast %c0_i32 : i32 to vector<1x1x2xi32>
    %185 = arith.cmpi eq, %183, %184 : vector<1x1x2xi32>
    %186 = vector.broadcast %178 : f32 to vector<1x1x2xf32>
    %187 = vector.broadcast %182 : f32 to vector<1x1x2xf32>
    %188 = arith.select %185, %186, %187 : vector<1x1x2xi1>, vector<1x1x2xf32>
    %c0_34 = arith.constant 0 : index
    %c0_35 = arith.constant 0 : index
    %c0_36 = arith.constant 0 : index
    %189 = vector.load %arg4[%c0_34, %c0_35, %c0_36] : memref<1x1x2xf32, #tpu.memory_space<vmem>>, vector<1x1x2xf32>
    tpu.vector_store %arg4[%c0_34, %c0_35, %c0_36], %188 {strides = array<i32>} : memref<1x1x2xf32, #tpu.memory_space<vmem>>, vector<1x1x2xf32>,
    return
  }
  func.func @transform_0(%arg0: i32) -> (i32, i32) {
    %c0_i32 = arith.constant 0 : i32
    %c0_i32_0 = arith.constant 0 : i32
    %c0_i32_1 = arith.constant 0 : i32
    return %c0_i32, %c0_i32_0 : i32, i32
  }
  func.func @transform_1(%arg0: i32) -> (i32, i32, i32) {
    %c0_i32 = arith.constant 0 : i32
    %c0_i32_0 = arith.constant 0 : i32
    %c0_i32_1 = arith.constant 0 : i32
    return %arg0, %c0_i32, %c0_i32_0 : i32, i32, i32
  }
  func.func @transform_2(%arg0: i32) -> (i32, i32, i32) {
    %c0_i32 = arith.constant 0 : i32
    %c0_i32_0 = arith.constant 0 : i32
    %c0_i32_1 = arith.constant 0 : i32
    return %arg0, %c0_i32, %c0_i32_0 : i32, i32, i32
  }
  func.func @transform_3(%arg0: i32) -> (i32, i32, i32) {
    %c0_i32 = arith.constant 0 : i32
    %c0_i32_0 = arith.constant 0 : i32
    %c0_i32_1 = arith.constant 0 : i32
    return %arg0, %c0_i32, %c0_i32_0 : i32, i32, i32
  }
}

</mosaic_0001>

<bundles_post_ra>
// kernel: tpu_custom_call.1
= control target key start
LH: loop header
LB: loop body
LE: loop exit
PB: predicated region body
PF: predicated region fallthrough
CT: control target
= control target key end

     0   :  { %8 = vsyncpa [#allocation3], 0  ;;  %s2238_s0 = inlined_call_operand.vmem [shape: f32[2,128], index: 0, kind: input, shape index: {}]   ;;  %s2239_s1 = inlined_call_operand.vmem [shape: f32[4,8,16], index: 1, kind: input, shape index: {}]   ;;  %s2240_s2 = inlined_call_operand.vmem [shape: f32[4,128,64], index: 2, kind: input, shape index: {}]   ;;  %s2241_s3 = inlined_call_operand.hbm [shape: f32[2,1,2], index: 3, kind: output, shape index: {}]  }
   0x1   :  { %10 = vsyncpa [#allocation3 + $0x1], 0  ;;  %s1548_s12 = smov 0   ;;  %s1550_s13 = smov 0  }
   0x2   :  { %s1552_s14 = smov 0   ;;  %s1554_s15 = smov 0  }
   0x3 LB: > { %s1569_s16 = sadd.s32 4294967295, %s1506_s15   ;;  %s1185_s17 = sadd.s32 4294967294, %s1506_s15   ;;  %s1506_s15 = sphi %s1554_s15, %s2282_s15   ;;  %s1502_s14 = sphi %s1552_s14, %s2281_s14   ;;  %s1498_s13 = sphi %s1550_s13, %s2280_s13   ;;  %s1494_s12 = sphi %s1548_s12, %s2279_s12  }
   0x4   : > { %s1573_s18 = sadd.s32 1, %s1506_s15   ;;  %s96_s19 = sadd.s32 1, %s1502_s14 }
   0x5   : > { %s93_s20 = ssub.s32 %s1506_s15, %s1573_s18  ;;  %p106_p0 = scmp.ne.s32.totalorder %s1502_s14, %s1498_s13 }
   0x6   : > { %p94_p1 = scmp.eq.s32.totalorder %s93_s20, 0  ;;  %p107_p2 = scmp.eq.s32.totalorder %s1569_s16, 1 }
   0x7   : > { %p112_p3 = scmp.ne.s32.totalorder %s1498_s13, %s1494_s12  ;;  %p113_p4 = scmp.eq.s32.totalorder %s1185_s17, 1 }
   0x8   : > { %s1584_s21 = scalar_select %p94_p1, %s1502_s14, %s96_s19  }
   0x9   : > { %p1586_p5 = por %p107_p2, %p106_p0  ;;  %p1590_p6 = por %p113_p4, %p112_p3 }
   0xa   : > { %p1188_p7 = scmp.ge.s32.totalorder %s1506_s15, 1  ;;  %p153_p8 = scmp.lt.s32.totalorder %s1506_s15, 3 }
   0xc   : > { %p154_p9 = pnand %p1188_p7, %p153_p8 }
   0xd   : > { %s1189_s24 = sshll.u32 (!%p154_p9), %s1569_s16, 1  ;;  %v1508_v0 = vmov (!%p154_p9), 9   ;;  %v1509_v1 = vmov (!%p154_p9), 8   ;;  %s1510_s29 = smov (!%p154_p9), 122   ;;  %vm227_vm0 = vcmask (!%p154_p9), 523264   ;;  %v2243_v50 = vmov (!%p154_p9), 0  }
   0xe   : > { %157 = sbr.rel (%p154_p9) target bundleno = 1137 (0x471), region = 32  ;;  %1421 = vset.pattern.permute.xlu1 (!%p154_p9), %v1508_v0  ;;  %1420 = vset.pattern.permute.xlu0 (!%p154_p9), %v1509_v1  ;;  %p183_p10 = scmp.lt.s32.totalorder (!%p154_p9), %s1189_s24, 3  ;;  %v1739_v51 = vld [vmem:[%s2238_s0 + $0x1] ss:$0 sm:$0xff] (!%p154_p9)  ;;  %v1744_v52 = vld [vmem:[%s2238_s0] ss:$0 sm:$0xff] (!%p154_p9) }
   0xf   : > { %s1511_s30 = smov (!%p154_p9), 2   ;;  %s1512_s4 = smov (!%p154_p9), 1  }
  0x10   : > { %s1514_s19 = smov (!%p154_p9), 127   ;;  %s180_s20 = sand.u32 (!%p154_p9), 1, %s1498_s13  }
  0x11   : > { %s181_s26 = scalar_lea.vmem (!%p154_p9), [#allocation2], %s180_s20  ;;  %s1527_s7 = smov (!%p154_p9), [#allocation2]  }
  0x12   : > { %s1118_s27 = sshll.u32 (!%p154_p9), %s181_s26, 4  ;;  %s2198_s27 = int_to_ptr.vmem [resolvable:$true] %s1118_s27 }
  0x13   : > { %s1444_s6 = scalar_lea.vmem (!%p154_p9), %s2198_s27, 16 }
  0x14   : > { %p1445_p11 = scmp.ne.s32.totalorder (!%p154_p9), %s2198_s27, %s1444_s6 }
  0x15   : > { %s2284_s24 = smov (!%p183_p10, %s1189_s24), 3 }
  0x16   : > { %s1190_s25 = sshll.u32 %s2284_s24, 3  ;;  %s1205_s5 = sshll.u32 %s2284_s24, 7 }
  0x17   : > { %s186_s28 = scalar_lea.vmem %s2239_s1, %s1190_s25  ;;  %s1617_s8 = scalar_lea.vmem %s2240_s2, %s1205_s5 }
  0x18   : > { %v1600_v2 = vld [vmem:[%s186_s28] sm:$0xff]  ;;  %v1604_v3 = vld [vmem:[%s186_s28 + $0x8] sm:$0xff]  ;;  %v1638_v11 = vld [vmem:[%s1617_s8 + $0x10] sm:$0xff]  ;;  %s1202_s24 = sshll.u32 %s1569_s16, 4  ;;  %s1106_s16 = scalar_lea.sflag [#allocation3], %s180_s20 }
  0x19   : > { %798 = vperm.xlu1 %1421, %v1600_v2   ;;  %786 = vperm.xlu0 %1420, %v1600_v2   ;;  %v1620_v4 = vld [vmem:[%s1617_s8] sm:$0xff]  ;;  %v1628_v7 = vld [vmem:[%s1617_s8 + $0x8] sm:$0xff]  ;;  %v234_v13 = vsel %vm227_vm0, %v1638_v11, 0.0  ;;  %v1645_v14 = vld [vmem:[%s1617_s8 + $0x18] sm:$0xff]  ;;  %vm854_vm5 = vcmp.gt.f32.partialorder %v1604_v3, 0.5  ;;  %vm853_vm6 = vcmp.gt.f32.partialorder %v1600_v2, 0.5  ;;  %s2196_s5 = scalar_lea.hbm %s2241_s3, %s1202_s24  ;;  %p1446_p12 = pnand %p1445_p11, %p1586_p5 }
  0x1a   : > { %v228_v5 = vsel %vm227_vm0, %v1620_v4, 0.0  ;;  %v1625_v6 = vld [vmem:[%s1617_s8 + $0x80] sm:$0xff]  ;;  %v231_v9 = vsel %vm227_vm0, %v1628_v7, 0.0  ;;  %v1635_v10 = vld [vmem:[%s1617_s8 + $0x88] sm:$0xff]  ;;  %v1648_v15 = vld [vmem:[%s1617_s8 + $0x90] sm:$0xff]  ;;  %v237_v16 = vsel %vm227_vm0, %v1645_v14, 0.0 }
  0x1b   : > { %v276_v8 = vsel %vm227_vm0, %v1625_v6, 0.0  ;;  %v279_v12 = vsel %vm227_vm0, %v1635_v10, 0.0  ;;  %v282_v17 = vsel %vm227_vm0, %v1648_v15, 0.0  ;;  %v1655_v18 = vld [vmem:[%s1617_s8 + $0x98] sm:$0xff]  ;;  %v1658_v19 = vld [vmem:[%s1617_s8 + $0x20] sm:$0xff]  ;;  %v1665_v22 = vld [vmem:[%s1617_s8 + $0x28] sm:$0xff]  ;;  %p1447_p13 = pneg %p1446_p12 }
  0x1c   : > { %v285_v20 = vsel %vm227_vm0, %v1655_v18, 0.0  ;;  %v240_v21 = vsel %vm227_vm0, %v1658_v19, 0.0  ;;  %v1668_v23 = vld [vmem:[%s1617_s8 + $0xa0] sm:$0xff]  ;;  %v243_v24 = vsel %vm227_vm0, %v1665_v22, 0.0  ;;  %v1675_v26 = vld [vmem:[%s1617_s8 + $0xa8] sm:$0xff]  ;;  %v1678_v27 = vld [vmem:[%s1617_s8 + $0x30] sm:$0xff] }
  0x1d   : > { %802 = vperm.xlu1 %1421, %v1604_v3   ;;  %790 = vperm.xlu0 %1420, %v1604_v3   ;;  %v288_v25 = vsel %vm227_vm0, %v1668_v23, 0.0  ;;  %v291_v28 = vsel %vm227_vm0, %v1675_v26, 0.0  ;;  %v246_v29 = vsel %vm227_vm0, %v1678_v27, 0.0  ;;  %v1685_v30 = vld [vmem:[%s1617_s8 + $0x38] sm:$0xff]  ;;  %v1688_v31 = vld [vmem:[%s1617_s8 + $0xb0] sm:$0xff]  ;;  %v1698_v35 = vld [vmem:[%s1617_s8 + $0x40] sm:$0xff] }
  0x1e   : > { %v249_v32 = vsel %vm227_vm0, %v1685_v30, 0.0  ;;  %v294_v33 = vsel %vm227_vm0, %v1688_v31, 0.0  ;;  %v1695_v34 = vld [vmem:[%s1617_s8 + $0xb8] sm:$0xff]  ;;  %v252_v37 = vsel %vm227_vm0, %v1698_v35, 0.0  ;;  %v1705_v38 = vld [vmem:[%s1617_s8 + $0x48] sm:$0xff]  ;;  %v1708_v39 = vld [vmem:[%s1617_s8 + $0xc0] sm:$0xff] }
  0x1f   : > { %v297_v36 = vsel %vm227_vm0, %v1695_v34, 0.0  ;;  %v255_v40 = vsel %vm227_vm0, %v1705_v38, 0.0  ;;  %v300_v41 = vsel %vm227_vm0, %v1708_v39, 0.0  ;;  %v1715_v42 = vld [vmem:[%s1617_s8 + $0xc8] sm:$0xff]  ;;  %v1718_v43 = vld [vmem:[%s1617_s8 + $0x50] sm:$0xff]  ;;  %v1725_v46 = vld [vmem:[%s1617_s8 + $0x58] sm:$0xff] }
  0x20   : > { %v303_v44 = vsel %vm227_vm0, %v1715_v42, 0.0  ;;  %v258_v45 = vsel %vm227_vm0, %v1718_v43, 0.0  ;;  %v1728_v47 = vld [vmem:[%s1617_s8 + $0xd0] sm:$0xff]  ;;  %v261_v48 = vsel %vm227_vm0, %v1725_v46, 0.0  ;;  %v1753_v0 = vld [vmem:[%s1617_s8 + $0xd8] sm:$0xff] }
  0x21   : > { %557 = vrot.lane.b32.xlu1 %v1604_v3, %s1510_s29  ;;  %555 = vrot.lane.b32.xlu0 %v1600_v2, %s1510_s29  ;;  %v306_v49 = vsel %vm227_vm0, %v1728_v47, 0.0 }
  0x22   : > { %1422 = vset.pattern.permute.xlu1 %v2243_v50  ;;  %1423 = vset.pattern.permute.xlu0 %v2243_v50 }
  0x25   : > { %639 = vrot.lane.b32.xlu1 %v1604_v3, %s1511_s30  ;;  %637 = vrot.lane.b32.xlu0 %v1600_v2, %s1511_s30 }
  0x29   : > { %573 = vrot.lane.b32.xlu1 %v1604_v3, %s1512_s4  ;;  %571 = vrot.lane.b32.xlu0 %v1600_v2, %s1512_s4 }
  0x48   : > { %229 = vadd.xlane.f32.xlu0 %v228_v5 }
  0x4c   : > { %277 = vadd.xlane.f32.xlu0 %v276_v8  ;;  %v309_v8 = vsel %vm227_vm0, %v1753_v0, 0.0 }
  0x4d   : > { %232 = vadd.xlane.f32.xlu1 %v231_v9 }
  0x50   : > { %280 = vadd.xlane.f32.xlu0 %v279_v12  ;;  %v1761_v12 = vld [vmem:[%s1617_s8 + $0x68] sm:$0xff] }
  0x51   : > { %235 = vadd.xlane.f32.xlu1 %v234_v13  ;;  %v1764_v13 = vld [vmem:[%s1617_s8 + $0x60] sm:$0xff] }
  0x54   : > { %238 = vadd.xlane.f32.xlu0 %v237_v16  ;;  %v267_v16 = vsel %vm227_vm0, %v1761_v12, 0.0 }
  0x55   : > { %283 = vadd.xlane.f32.xlu1 %v282_v17  ;;  %v264_v17 = vsel %vm227_vm0, %v1764_v13, 0.0 }
  0x58   : > { %286 = vadd.xlane.f32.xlu0 %v285_v20  ;;  %v1772_v20 = vld [vmem:[%s1617_s8 + $0xe8] sm:$0xff] }
  0x59   : > { %241 = vadd.xlane.f32.xlu1 %v240_v21  ;;  %v1775_v21 = vld [vmem:[%s1617_s8 + $0xe0] sm:$0xff] }
  0x5c   : > { %244 = vadd.xlane.f32.xlu0 %v243_v24  ;;  %v315_v24 = vsel %vm227_vm0, %v1772_v20, 0.0 }
  0x5d   : > { %289 = vadd.xlane.f32.xlu1 %v288_v25  ;;  %v312_v25 = vsel %vm227_vm0, %v1775_v21, 0.0 }
  0x60   : > { %292 = vadd.xlane.f32.xlu0 %v291_v28  ;;  %v1782_v28 = vld [vmem:[%s1617_s8 + $0x78] sm:$0xff] }
  0x61   : > { %247 = vadd.xlane.f32.xlu1 %v246_v29  ;;  %v1785_v29 = vld [vmem:[%s1617_s8 + $0x70] sm:$0xff] }
  0x64   : > { %250 = vadd.xlane.f32.xlu0 %v249_v32  ;;  %v273_v32 = vsel %vm227_vm0, %v1782_v28, 0.0 }
  0x65   : > { %295 = vadd.xlane.f32.xlu1 %v294_v33  ;;  %v270_v33 = vsel %vm227_vm0, %v1785_v29, 0.0 }
  0x68   : > { %298 = vadd.xlane.f32.xlu0 %v297_v36  ;;  %v1792_v36 = vld [vmem:[%s1617_s8 + $0xf8] sm:$0xff] }
  0x69   : > { %253 = vadd.xlane.f32.xlu1 %v252_v37  ;;  %v1795_v37 = vld [vmem:[%s1617_s8 + $0xf0] sm:$0xff]  ;;  %s1448_s8 = sshll.u32 %s1527_s7, 4  ;;  %s1449_s8 = int_to_ptr.vmem [resolvable:$false] %s1448_s8 }
  0x6a   : > { %s1450_s9 = scalar_lea.vmem %s1449_s8, 32  ;;  %p1451_p0 = scmp.lt.s32.totalorder %s2198_s27, %s1449_s8 }
  0x6b   : > { %p1452_p1 = scmp.lt.s32.totalorder %s1450_s9, %s1444_s6 }
  0x6c   : > { %256 = vadd.xlane.f32.xlu0 %v255_v40  ;;  %v321_v40 = vsel %vm227_vm0, %v1792_v36, 0.0 }
  0x6d   : > { %301 = vadd.xlane.f32.xlu1 %v300_v41  ;;  %v318_v41 = vsel %vm227_vm0, %v1795_v37, 0.0  ;;  %p1453_p2 = por %p1452_p1, %p1451_p0 }
  0x6f   : > { %p1454_p3 = pnand %p1453_p2, %p1447_p13 }
  0x70   : > { %304 = vadd.xlane.f32.xlu0 %v303_v44 }
  0x71   : > { %259 = vadd.xlane.f32.xlu1 %v258_v45 }
  0x74   : > { %262 = vadd.xlane.f32.xlu0 %v261_v48 }
  0x75   : > { %307 = vadd.xlane.f32.xlu1 %v306_v49 }
  0x98   : > { %v799_v53 = vpop.permute.xlu1 %798  ;;  %v787_v54 = vpop.permute.xlu0 %786 }
  0x99   : > { %v805_v55 = vsub.f32 %v1739_v51, %v799_v53  ;;  %v793_v56 = vsub.f32 %v1744_v52, %v787_v54 }
  0x9b   : > { %v807_v57 = vmul.f32 %v805_v55, %v805_v55  ;;  %v795_v58 = vmul.f32 %v793_v56, %v793_v56 }
  0x9c   : > { %v803_v59 = vpop.permute.xlu1 %802  ;;  %v791_v60 = vpop.permute.xlu0 %790 }
  0x9d   : > { %v806_v61 = vsub.f32 %v1739_v51, %v803_v59  ;;  %v794_v62 = vsub.f32 %v1744_v52, %v791_v60  ;;  %v1750_v63 = vadd.f32 %v807_v57, %v795_v58 }
  0x9f   : > { %v808_v1 = vmul.f32 %v806_v61, %v806_v61  ;;  %v796_v5 = vmul.f32 %v794_v62, %v794_v62  ;;  %811 = vmin.xlane.f32.xlu0 %v1750_v63 }
  0xa0   : > { %v556_v44 = vpop.permute.xlu0 %555  ;;  %v558_v45 = vpop.permute.xlu1 %557 }
  0xa1   : > { %v1758_v9 = vadd.f32 %v808_v1, %v796_v5  ;;  %v1802_v53 = vsub.f32 %v1600_v2, %v556_v44  ;;  %v1806_v55 = vsub.f32 %v1604_v3, %v558_v45 }
  0xa3   : > { %310 = vadd.xlane.f32.xlu0 %v309_v8  ;;  %813 = vmin.xlane.f32.xlu1 %v1758_v9 }
  0xa4   : > { %v638_v48 = vpop.permute.xlu0 %637  ;;  %v640_v49 = vpop.permute.xlu1 %639 }
  0xa5   : > { %v1810_v58 = vsub.f32 %v1600_v2, %v638_v48  ;;  %v1814_v59 = vsub.f32 %v1604_v3, %v640_v49 }
  0xa7   : > { %268 = vadd.xlane.f32.xlu0 %v267_v16  ;;  %265 = vadd.xlane.f32.xlu1 %v264_v17 }
  0xa8   : > { %v572_v54 = vpop.permute.xlu0 %571  ;;  %v574_v57 = vpop.permute.xlu1 %573 }
  0xa9   : > { %v577_v56 = vmul.f32 %v572_v54, %v1802_v53  ;;  %v578_v60 = vmul.f32 %v574_v57, %v1806_v55  ;;  %v647_v61 = vmul.f32 %v1810_v58, %v572_v54  ;;  %v648_v62 = vmul.f32 %v1814_v59, %v574_v57 }
  0xab   : > { %316 = vadd.xlane.f32.xlu0 %v315_v24  ;;  %313 = vadd.xlane.f32.xlu1 %v312_v25 }
  0xaf   : > { %274 = vadd.xlane.f32.xlu0 %v273_v32  ;;  %271 = vadd.xlane.f32.xlu1 %v270_v33 }
  0xb3   : > { %322 = vadd.xlane.f32.xlu0 %v321_v40  ;;  %319 = vadd.xlane.f32.xlu1 %v318_v41 }
  0xc4   : > { %563 = vrot.lane.b32.xlu1 %v1600_v2, %s1514_s19 }
  0xc8   : > { %581 = vrot.lane.b32.xlu1 %v577_v56, %s1514_s19 }
  0xc9   : > { %565 = vrot.lane.b32.xlu0 %v1604_v3, %s1514_s19 }
  0xcc   : > { %583 = vrot.lane.b32.xlu1 %v578_v60, %s1514_s19 }
  0xcd   : > { %651 = vrot.lane.b32.xlu0 %v647_v61, %s1514_s19 }
  0xd0   : > { %653 = vrot.lane.b32.xlu1 %v648_v62, %s1514_s19 }
  0xd5   : > { %v230_v1 = vpop.xlane.xlu0 %229 }
  0xd6   : > { %v325_v16 = vmul.f32 0.015625, %v230_v1 }
  0xd8   : > { %v357_v25 = vsub.f32 %v1620_v4, %v325_v16 }
  0xd9   : > { %v278_v5 = vpop.xlane.xlu0 %277 }
  0xda   : > { %v233_v8 = vpop.xlane.xlu1 %232  ;;  %v341_v32 = vmul.f32 0.015625, %v278_v5  ;;  %v389_v44 = vmul.f32 %v357_v25, %v357_v25 }
  0xdb   : > { %v326_v41 = vmul.f32 0.015625, %v233_v8 }
  0xdc   : > { %v373_v40 = vsub.f32 %v1625_v6, %v341_v32  ;;  %v421_v57 = vsel %vm227_vm0, %v389_v44, 0.0 }
  0xdd   : > { %v281_v17 = vpop.xlane.xlu0 %280  ;;  %v358_v62 = vsub.f32 %v1628_v7, %v326_v41 }
  0xde   : > { %v236_v24 = vpop.xlane.xlu1 %235  ;;  %v342_v45 = vmul.f32 0.015625, %v281_v17  ;;  %v405_v61 = vmul.f32 %v373_v40, %v373_v40 }
  0xdf   : > { %v327_v54 = vmul.f32 0.015625, %v236_v24  ;;  %v390_v17 = vmul.f32 %v358_v62, %v358_v62 }
  0xe0   : > { %v374_v60 = vsub.f32 %v1635_v10, %v342_v45  ;;  %v469_v16 = vsel %vm227_vm0, %v405_v61, 0.0 }
  0xe1   : > { %v239_v33 = vpop.xlane.xlu0 %238  ;;  %v359_v6 = vsub.f32 %v1638_v11, %v327_v54  ;;  %v424_v7 = vsel %vm227_vm0, %v390_v17, 0.0 }
  0xe2   : > { %v284_v48 = vpop.xlane.xlu1 %283  ;;  %v328_v56 = vmul.f32 0.015625, %v239_v33  ;;  %v406_v24 = vmul.f32 %v374_v60, %v374_v60 }
  0xe3   : > { %v343_v1 = vmul.f32 0.015625, %v284_v48  ;;  %v391_v33 = vmul.f32 %v359_v6, %v359_v6 }
  0xe4   : > { %v360_v4 = vsub.f32 %v1645_v14, %v328_v56  ;;  %v472_v14 = vsel %vm227_vm0, %v406_v24, 0.0 }
  0xe5   : > { %v287_v49 = vpop.xlane.xlu0 %286  ;;  %v375_v40 = vsub.f32 %v1648_v15, %v343_v1  ;;  %v427_v48 = vsel %vm227_vm0, %v391_v33, 0.0 }
  0xe6   : > { %v242_v5 = vpop.xlane.xlu1 %241  ;;  %v344_v25 = vmul.f32 0.015625, %v287_v49  ;;  %v392_v10 = vmul.f32 %v360_v4, %v360_v4 }
  0xe7   : > { %v329_v32 = vmul.f32 0.015625, %v242_v5  ;;  %v407_v54 = vmul.f32 %v375_v40, %v375_v40 }
  0xe8   : > { %v376_v41 = vsub.f32 %v1655_v18, %v344_v25  ;;  %v430_v49 = vsel %vm227_vm0, %v392_v10, 0.0  ;;  %v1516_v10 = vmov 2  }
  0xe9   : > { %v245_v8 = vpop.xlane.xlu0 %244  ;;  %v361_v56 = vsub.f32 %v1658_v19, %v329_v32  ;;  %v475_v18 = vsel %vm227_vm0, %v407_v54, 0.0 }
  0xea   : > { %v330_v44 = vmul.f32 0.015625, %v245_v8  ;;  %v290_v11 = vpop.xlane.xlu1 %289  ;;  %v408_v60 = vmul.f32 %v376_v41, %v376_v41 }
  0xeb   : > { %v393_v62 = vmul.f32 %v361_v56, %v361_v56 }
  0xec   : > { %422 = vadd.xlane.f32.xlu0 %v421_v57  ;;  %v362_v15 = vsub.f32 %v1665_v22, %v330_v44  ;;  %v345_v57 = vmul.f32 0.015625, %v290_v11  ;;  %v478_v4 = vsel %vm227_vm0, %v408_v60, 0.0 }
  0xed   : > { %v293_v45 = vpop.xlane.xlu0 %292  ;;  %v433_v19 = vsel %vm227_vm0, %v393_v62, 0.0 }
  0xee   : > { %v346_v61 = vmul.f32 0.015625, %v293_v45  ;;  %v394_v5 = vmul.f32 %v362_v15, %v362_v15  ;;  %v377_v6 = vsub.f32 %v1668_v23, %v345_v57  ;;  %v248_v23 = vpop.xlane.xlu1 %247 }
  0xf0   : > { %470 = vadd.xlane.f32.xlu0 %v469_v16  ;;  %v378_v1 = vsub.f32 %v1675_v26, %v346_v61  ;;  %v436_v22 = vsel %vm227_vm0, %v394_v5, 0.0  ;;  %v409_v8 = vmul.f32 %v377_v6, %v377_v6  ;;  %v1515_v26 = vmov 0.0|0.0  }
  0xf1   : > { %1310 = vmatprep.subr.bf16.mxu0 %v1515_v26  ;;  %1334 = vmatprep.subr.bf16.mxu1 %v1515_v26  ;;  %v251_v32 = vpop.xlane.xlu0 %250  ;;  %v331_v6 = vmul.f32 0.015625, %v248_v23 }
  0xf2   : > { %v410_v16 = vmul.f32 %v378_v1, %v378_v1  ;;  %v481_v17 = vsel %vm227_vm0, %v409_v8, 0.0  ;;  %v296_v25 = vpop.xlane.xlu1 %295  ;;  %v332_v54 = vmul.f32 0.015625, %v251_v32 }
  0xf3   : > { %v347_v8 = vmul.f32 0.015625, %v296_v25 }
  0xf4   : > { %425 = vadd.xlane.f32.xlu1 %v424_v7  ;;  %473 = vadd.xlane.f32.xlu0 %v472_v14  ;;  %v484_v24 = vsel %vm227_vm0, %v410_v16, 0.0  ;;  %v1517_v14 = vmov 4  }
  0xf5   : > { %v299_v40 = vpop.xlane.xlu0 %298  ;;  %v379_v32 = vsub.f32 %v1688_v31, %v347_v8  ;;  %v1518_v8 = vmov 5  }
  0xf6   : > { %v1846_v33 = vpop.xlane.xlu1 %253 }
  0xf8   : > { %428 = vadd.xlane.f32.xlu1 %v427_v48  ;;  %431 = vadd.xlane.f32.xlu0 %v430_v49  ;;  %v2242_v48 = vlaneseq }
  0xf9   : > { %v1855_v41 = vpop.xlane.xlu0 %256 }
  0xfa   : > { %v1852_v7 = vpop.xlane.xlu1 %301  ;;  %v1867_v56 = vand.u32 127, %v2242_v48  ;;  %v1521_v48 = vmov 1  }
  0xfc   : > { %476 = vadd.xlane.f32.xlu1 %v475_v18  ;;  %479 = vadd.xlane.f32.xlu0 %v478_v4  ;;  %v364_v18 = vsub.f32 %v1685_v30, %v332_v54 }
  0xfd   : > { %v1860_v11 = vpop.xlane.xlu0 %304 }
  0xfe   : > { %v1858_v44 = vpop.xlane.xlu1 %259  ;;  %v396_v5 = vmul.f32 %v364_v18, %v364_v18 }
 0x100   : > { %434 = vadd.xlane.f32.xlu1 %v433_v19  ;;  %437 = vadd.xlane.f32.xlu0 %v436_v22  ;;  %v442_v22 = vsel %vm227_vm0, %v396_v5, 0.0 }
 0x101   : > { %v1864_v49 = vpop.xlane.xlu0 %262 }
 0x102   : > { %v1862_v45 = vpop.xlane.xlu1 %307 }
 0x104   : > { %482 = vadd.xlane.f32.xlu1 %v481_v17  ;;  %485 = vadd.xlane.f32.xlu0 %v484_v24  ;;  %v348_v24 = vmul.f32 0.015625, %v299_v40 }
 0x115   : > { %591 = vperm.xlu1 %1422, %v1802_v53  }
 0x119   : > { %1424 = vset.pattern.permute.xlu1 %v1516_v10 }
 0x11a   : > { %661 = vperm.xlu1 %1424, %v1810_v58   ;;  %596 = vperm.xlu0 %1423, %v1806_v55  }
 0x11e   : > { %666 = vperm.xlu1 %1424, %v1814_v59   ;;  %1426 = vset.pattern.permute.xlu0 %v1517_v14 }
 0x122   : > { %1425 = vset.pattern.permute.xlu1 %v1517_v14 }
 0x12c   : > { %v812_v60 = vpop.xlane.xlu0 %811 }
 0x12d   : > { %vm817_vm2 = vcmp.eq.f32.partialorder %v1750_v63, %v812_v60  ;;  %v363_v63 = vsub.f32 %v1678_v27, %v331_v6  ;;  %v380_v60 = vsub.f32 %v1695_v34, %v348_v24 }
 0x12f   : > { %v395_v23 = vmul.f32 %v363_v63, %v363_v63  ;;  %v412_v40 = vmul.f32 %v380_v60, %v380_v60 }
 0x130   : > { %v814_v15 = vpop.xlane.xlu1 %813  ;;  %v1886_v19 = vpop.xlane.xlu0 %310 }
 0x131   : > { %vm818_vm1 = vcmp.eq.f32.partialorder %v1758_v9, %v814_v15  ;;  %v1883_v9 = vsel %vm817_vm2, %v1867_v56, 128  ;;  %v439_v25 = vsel %vm227_vm0, %v395_v23, 0.0  ;;  %v490_v31 = vsel %vm227_vm0, %v412_v40, 0.0 }
 0x132   : > { %v1871_v57 = vsel %vm818_vm1, %v1867_v56, 128  ;;  %v822_v30 = vshra.s32 %v1883_v9, 16  ;;  %v1519_v23 = vmov 6   ;;  %v1520_v40 = vmov 10  }
 0x133   : > { %v836_v61 = vshra.s32 %v1871_v57, 16 }
 0x134   : > { %v1875_v62 = vpop.xlane.xlu1 %265  ;;  %v1893_v17 = vcvt.s32.f32 %v822_v30  ;;  %v1896_v54 = vpop.xlane.xlu0 %268 }
 0x135   : > { %v1878_v4 = vcvt.s32.f32 %v836_v61  ;;  %v411_v61 = vmul.f32 %v379_v32, %v379_v32 }
 0x137   : > { %v487_v18 = vsel %vm227_vm0, %v411_v61, 0.0 }
 0x138   : > { %v1880_v1 = vpop.xlane.xlu1 %313  ;;  %v1903_v27 = vpop.xlane.xlu0 %316 }
 0x139   : > { %839 = vmin.xlane.f32.xlu0 %v1878_v4 }
 0x13c   : > { %v1891_v16 = vpop.xlane.xlu1 %271  ;;  %v1907_v6 = vpop.xlane.xlu0 %274 }
 0x13d   : > { %443 = vadd.xlane.f32.xlu0 %v442_v22 }
 0x140   : > { %v1899_v15 = vpop.xlane.xlu1 %319  ;;  %v1910_v34 = vpop.xlane.xlu0 %322 }
 0x142   : > { %825 = vmin.xlane.f32.xlu1 %v1893_v17 }
 0x144   : > { %v564_v5 = vpop.permute.xlu1 %563  ;;  %v566_v63 = vpop.permute.xlu0 %565 }
 0x145   : > { %v646_v32 = vmul.f32 %v1814_v59, %v566_v63 }
 0x146   : > { %440 = vadd.xlane.f32.xlu1 %v439_v25  ;;  %v569_v25 = vmul.f32 %v564_v5, %v1802_v53 }
 0x148   : > { %v582_v22 = vpop.permute.xlu1 %581 }
 0x149   : > { %v587_v61 = vsub.f32 %v569_v25, %v582_v22  ;;  %v333_v22 = vmul.f32 0.015625, %v1846_v33  ;;  %v1522_v33 = vmov 3  }
 0x14a   : > { %488 = vadd.xlane.f32.xlu1 %v487_v18  ;;  %v570_v18 = vmul.f32 %v566_v63, %v1806_v55 }
 0x14b   : > { %v365_v63 = vsub.f32 %v1698_v35, %v333_v22 }
 0x14c   : > { %v584_v30 = vpop.permute.xlu1 %583 }
 0x14e   : > { %491 = vadd.xlane.f32.xlu1 %v490_v31  ;;  %v588_v31 = vsub.f32 %v570_v18, %v584_v30  ;;  %v349_v30 = vmul.f32 0.015625, %v1852_v7 }
 0x150   : > { %v654_v24 = vpop.permute.xlu1 %653 }
 0x151   : > { %v1917_v60 = vsub.f32 %v646_v32, %v654_v24  ;;  %v652_v24 = vpop.permute.xlu0 %651  ;;  %v645_v32 = vmul.f32 %v1810_v58, %v564_v5  ;;  %v381_v5 = vsub.f32 %v1708_v39, %v349_v30 }
 0x153   : > { %708 = vperm.xlu0 %1426, %v1814_v59   ;;  %v1929_v25 = vsub.f32 %v645_v32, %v652_v24  ;;  %v413_v7 = vmul.f32 %v381_v5, %v381_v5 }
 0x155   : > { %v493_v39 = vsel %vm227_vm0, %v413_v7, 0.0 }
 0x157   : > { %1433 = vset.pattern.permute.xlu0 %v1518_v8 }
 0x158   : > { %724 = vperm.xlu0 %1433, %v1810_v58  }
 0x15c   : > { %1434 = vset.pattern.permute.xlu0 %v1519_v23 }
 0x15d   : > { %748 = vperm.xlu0 %1434, %v1814_v59  }
 0x15f   : > { %704 = vperm.xlu1 %1425, %v1810_v58  }
 0x161   : > { %758 = vperm.xlu0 %1434, %v1917_v60  }
 0x163   : > { %1427 = vset.pattern.permute.xlu1 %v2243_v50 }
 0x164   : > { %607 = vperm.xlu1 %1427, %v587_v61  }
 0x165   : > { %1439 = vset.pattern.permute.xlu0 %v1520_v40 }
 0x168   : > { %612 = vperm.xlu1 %1427, %v588_v31  }
 0x16c   : > { %1428 = vset.pattern.permute.xlu1 %v1521_v48 }
 0x16d   : > { %618 = vperm.xlu1 %1428, %v1802_v53   ;;  %v350_v53 = vmul.f32 0.015625, %v1860_v11 }
 0x16f   : > { %v382_v18 = vsub.f32 %v1715_v42, %v350_v53 }
 0x171   : > { %622 = vperm.xlu1 %1428, %v1806_v55   ;;  %v397_v55 = vmul.f32 %v365_v63, %v365_v63  ;;  %v414_v30 = vmul.f32 %v382_v18, %v382_v18 }
 0x175   : > { %1429 = vset.pattern.permute.xlu1 %v1516_v10  ;;  %v445_v10 = vsel %vm227_vm0, %v397_v55, 0.0 }
 0x176   : > { %673 = vperm.xlu1 %1429, %v1929_v25  }
 0x179   : > { %v423_v48 = vpop.xlane.xlu0 %422 }
 0x17a   : > { %678 = vperm.xlu1 %1429, %v1917_v60   ;;  %v517_v31 = vmul.f32 0.015873017, %v423_v48  ;;  %v496_v48 = vsel %vm227_vm0, %v414_v30, 0.0 }
 0x17d   : > { %v471_v61 = vpop.xlane.xlu0 %470 }
 0x17e   : > { %1430 = vset.pattern.permute.xlu1 %v1522_v33  ;;  %v533_v35 = vmul.f32 0.015873017, %v471_v61 }
 0x17f   : > { %684 = vperm.xlu1 %1430, %v1810_v58  }
 0x180   : > { %446 = vadd.xlane.f32.xlu0 %v445_v10 }
 0x181   : > { %v426_v24 = vpop.xlane.xlu1 %425  ;;  %v474_v32 = vpop.xlane.xlu0 %473 }
 0x182   : > { %v518_v22 = vmul.f32 0.015873017, %v426_v24  ;;  %v534_v11 = vmul.f32 0.015873017, %v474_v32 }
 0x183   : > { %688 = vperm.xlu1 %1430, %v1814_v59  }
 0x184   : > { %494 = vadd.xlane.f32.xlu0 %v493_v39  ;;  %v1311_v63 = vpack.c.bf16 %v518_v22, %v517_v31  ;;  %v1335_v42 = vpack.c.bf16 %v534_v11, %v533_v35 }
 0x185   : > { %v429_v53 = vpop.xlane.xlu1 %428  ;;  %v432_v33 = vpop.xlane.xlu0 %431 }
 0x186   : > { %v519_v50 = vmul.f32 0.015873017, %v429_v53  ;;  %v520_v55 = vmul.f32 0.015873017, %v432_v33  ;;  %1312 = vmatpush3.bf16.msra.mxu0 %v1311_v63  ;;  %1336 = vmatpush3.bf16.msra.mxu1 %v1335_v42  ;;  %v1523_v42 = vmov 7   ;;  %v335_v53 = vmul.f32 0.015625, %v1858_v44 }
 0x187   : > { %1431 = vset.pattern.permute.xlu1 %v1519_v23  ;;  %1313 = vmatprep.subr.bf16.mxu0 %v1515_v26 }
 0x188   : > { %v1314_v5 = vpack.c.bf16 %v520_v55, %v519_v50  ;;  %497 = vadd.xlane.f32.xlu0 %v496_v48  ;;  %744 = vperm.xlu1 %1431, %v1810_v58   ;;  %v336_v55 = vmul.f32 0.015625, %v1864_v49 }
 0x189   : > { %v477_v61 = vpop.xlane.xlu1 %476  ;;  %v480_v18 = vpop.xlane.xlu0 %479  ;;  %1337 = vmatprep.subr.bf16.mxu1 %v1515_v26 }
 0x18a   : > { %v535_v10 = vmul.f32 0.015873017, %v477_v61  ;;  %v536_v7 = vmul.f32 0.015873017, %v480_v18  ;;  %1315 = vmatpush3.bf16.msra.mxu0 %v1314_v5 }
 0x18b   : > { %1316 = vmatprep.subr.bf16.mxu0 %v1515_v26 }
 0x18c   : > { %v1338_v31 = vpack.c.bf16 %v536_v7, %v535_v10  ;;  %1432 = vset.pattern.permute.xlu1 %v1517_v14 }
 0x18d   : > { %v435_v35 = vpop.xlane.xlu1 %434  ;;  %714 = vperm.xlu1 %1432, %v1929_v25   ;;  %v438_v24 = vpop.xlane.xlu0 %437 }
 0x18e   : > { %v521_v50 = vmul.f32 0.015873017, %v435_v35  ;;  %v522_v32 = vmul.f32 0.015873017, %v438_v24  ;;  %1339 = vmatpush3.bf16.msra.mxu1 %v1338_v31 }
 0x18f   : > { %1340 = vmatprep.subr.bf16.mxu1 %v1515_v26 }
 0x190   : > { %v1317_v22 = vpack.c.bf16 %v522_v32, %v521_v50 }
 0x191   : > { %v483_v11 = vpop.xlane.xlu1 %482  ;;  %718 = vperm.xlu1 %1432, %v1917_v60   ;;  %v486_v39 = vpop.xlane.xlu0 %485  ;;  %v334_v60 = vmul.f32 0.015625, %v1855_v41 }
 0x192   : > { %v537_v30 = vmul.f32 0.015873017, %v483_v11  ;;  %v538_v63 = vmul.f32 0.015873017, %v486_v39  ;;  %1318 = vmatpush3.bf16.msra.mxu0 %v1317_v22 }
 0x193   : > { %1319 = vmatprep.subr.bf16.mxu0 %v1515_v26 }
 0x194   : > { %v1341_v14 = vpack.c.bf16 %v538_v63, %v537_v30 }
 0x195   : > { %1435 = vset.pattern.permute.xlu1 %v1518_v8  ;;  %v366_v8 = vsub.f32 %v1705_v38, %v334_v60  ;;  %v592_v33 = vpop.permute.xlu1 %591 }
 0x196   : > { %728 = vperm.xlu1 %1435, %v1814_v59   ;;  %1342 = vmatpush3.bf16.msra.mxu1 %v1341_v14 }
 0x197   : > { %1343 = vmatprep.subr.bf16.mxu1 %v1515_v26  ;;  %v398_v48 = vmul.f32 %v366_v8, %v366_v8 }
 0x199   : > { %v1972_v5 = vpop.permute.xlu1 %661  ;;  %v448_v44 = vsel %vm227_vm0, %v398_v48, 0.0 }
 0x19a   : > { %1436 = vset.pattern.permute.xlu1 %v1519_v23  ;;  %v1966_v23 = vpop.permute.xlu0 %596 }
 0x19b   : > { %754 = vperm.xlu1 %1436, %v1929_v25   ;;  %v835_v25 = vand.u32 65535, %v1871_v57 }
 0x19d   : > { %v837_v38 = vcvt.s32.f32 %v835_v25  ;;  %v1982_v18 = vpop.permute.xlu1 %666 }
 0x19f   : > { %1437 = vset.pattern.permute.xlu1 %v1523_v42 }
 0x1a0   : > { %764 = vperm.xlu1 %1437, %v1810_v58   ;;  %v367_v58 = vsub.f32 %v1718_v43, %v335_v53 }
 0x1a2   : > { %v399_v49 = vmul.f32 %v367_v58, %v367_v58 }
 0x1a4   : > { %768 = vperm.xlu1 %1437, %v1814_v59   ;;  %v368_v59 = vsub.f32 %v1725_v46, %v336_v55  ;;  %v351_v46 = vmul.f32 0.015625, %v1862_v45  ;;  %v451_v10 = vsel %vm227_vm0, %v399_v49, 0.0 }
 0x1a6   : > { %v400_v43 = vmul.f32 %v368_v59, %v368_v59  ;;  %v603_v59 = vmul.f32 %v1739_v51, %v592_v33 }
 0x1a8   : > { %1438 = vset.pattern.permute.xlu1 %v1520_v40  ;;  %v352_v40 = vmul.f32 0.015625, %v1886_v19  ;;  %v821_v19 = vand.u32 65535, %v1883_v9  ;;  %v454_v7 = vsel %vm227_vm0, %v400_v43, 0.0 }
 0x1aa   : > { %v384_v57 = vsub.f32 %v1753_v0, %v352_v40  ;;  %v823_v35 = vcvt.s32.f32 %v821_v19 }
 0x1ac   : > { %v416_v31 = vmul.f32 %v384_v57, %v384_v57 }
 0x1ae   : > { %v502_v45 = vsel %vm227_vm0, %v416_v31, 0.0 }
 0x1c6   : > { %v1974_v41 = vpop.xlane.xlu0 %839 }
 0x1c7   : > { %vm841_vm3 = vcmp.eq.f32.partialorder %v1878_v4, %v1974_v41  ;;  %v383_v4 = vsub.f32 %v1728_v47, %v351_v46 }
 0x1c8   : > { %449 = vadd.xlane.f32.xlu1 %v448_v44  ;;  %v842_v61 = vsel %vm841_vm3, %v837_v38, inf  ;;  %v2247_v44 = vmov 0  }
 0x1c9   : > { %843 = vmin.xlane.f32.xlu0 %v842_v61  ;;  %v415_v50 = vmul.f32 %v383_v4, %v383_v4  ;;  %v856_v49 = vsel %vm854_vm5, 1, %v2247_v44  ;;  %v855_v57 = vsel %vm853_vm6, 1, %v2247_v44  ;;  %v604_v61 = vmul.f32 %v1739_v51, %v1966_v23 }
 0x1ca   : > { %v444_v0 = vpop.xlane.xlu0 %443  ;;  %v669_v4 = vmul.f32 %v1739_v51, %v1972_v5 }
 0x1cb   : > { %v524_v11 = vmul.f32 0.015873017, %v444_v0  ;;  %v499_v47 = vsel %vm227_vm0, %v415_v50, 0.0  ;;  %v337_v0 = vmul.f32 0.015625, %v1875_v62 }
 0x1cc   : > { %452 = vadd.xlane.f32.xlu1 %v451_v10  ;;  %v338_v10 = vmul.f32 0.015625, %v1896_v54  ;;  %v670_v54 = vmul.f32 %v1739_v51, %v1982_v18 }
 0x1cd   : > { %455 = vadd.xlane.f32.xlu0 %v454_v7 }
 0x1ce   : > { %v370_v31 = vsub.f32 %v1761_v12, %v338_v10  ;;  %v353_v12 = vmul.f32 0.015625, %v1880_v1 }
 0x1cf   : > { %v1987_v24 = vpop.xlane.xlu1 %825 }
 0x1d0   : > { %vm827_vm4 = vcmp.eq.f32.partialorder %v1893_v17, %v1987_v24 }
 0x1d1   : > { %503 = vadd.xlane.f32.xlu0 %v502_v45  ;;  %v828_v9 = vsel %vm827_vm4, %v823_v35, inf }
 0x1d2   : > { %829 = vmin.xlane.f32.xlu1 %v828_v9  ;;  %v1992_v32 = vpop.permute.xlu0 %708 }
 0x1d3   : > { %v441_v22 = vpop.xlane.xlu1 %440 }
 0x1d4   : > { %v523_v39 = vmul.f32 0.015873017, %v441_v22 }
 0x1d6   : > { %v1320_v30 = vpack.c.bf16 %v524_v11, %v523_v39  ;;  %500 = vadd.xlane.f32.xlu1 %v499_v47  ;;  %v402_v11 = vmul.f32 %v370_v31, %v370_v31  ;;  %v369_v39 = vsub.f32 %v1764_v13, %v337_v0  ;;  %v356_v0 = vmul.f32 0.015625, %v1910_v34 }
 0x1d7   : > { %v489_v63 = vpop.xlane.xlu1 %488  ;;  %v1995_v14 = vpop.permute.xlu0 %724 }
 0x1d8   : > { %1321 = vmatpush3.bf16.msra.mxu0 %v1320_v30  ;;  %v539_v42 = vmul.f32 0.015873017, %v489_v63  ;;  %v460_v1 = vsel %vm227_vm0, %v402_v11, 0.0 }
 0x1d9   : > { %1322 = vmatprep.subr.bf16.mxu0 %v1515_v26 }
 0x1db   : > { %v492_v17 = vpop.xlane.xlu1 %491 }
 0x1dc   : > { %v540_v60 = vmul.f32 0.015873017, %v492_v17  ;;  %v749_v8 = vpop.permute.xlu0 %748  ;;  %v385_v17 = vsub.f32 %v1775_v21, %v353_v12  ;;  %v388_v12 = vsub.f32 %v1792_v36, %v356_v0 }
 0x1dd   : > { %v1999_v55 = vmul.f32 %v1739_v51, %v749_v8 }
 0x1de   : > { %v1344_v53 = vpack.c.bf16 %v540_v60, %v539_v42  ;;  %v354_v42 = vmul.f32 0.015625, %v1903_v27  ;;  %v401_v60 = vmul.f32 %v369_v39, %v369_v39  ;;  %v417_v21 = vmul.f32 %v385_v17, %v385_v17 }
 0x1df   : > { %v2001_v25 = vpop.permute.xlu1 %704 }
 0x1e0   : > { %1345 = vmatpush3.bf16.msra.mxu1 %v1344_v53  ;;  %v2003_v48 = vpop.permute.xlu0 %758  ;;  %v386_v27 = vsub.f32 %v1772_v20, %v354_v42  ;;  %v505_v20 = vsel %vm227_vm0, %v417_v21, 0.0 }
 0x1e1   : > { %v762_v58 = vsub.f32 %v2003_v48, %v1999_v55  ;;  %1346 = vmatprep.subr.bf16.mxu1 %v1515_v26  ;;  %v1525_v48 = vmov 0.0  }
 0x1e3   : > { %v608_v40 = vpop.permute.xlu1 %607 }
 0x1e4   : > { %v615_v38 = vsub.f32 %v608_v40, %v603_v59  ;;  %v339_v59 = vmul.f32 0.015625, %v1891_v16  ;;  %v731_v16 = vmul.f32 %v1744_v52, %v1995_v14  ;;  %v2274_v14 = vlaneseq }
 0x1e7   : > { %v613_v43 = vpop.permute.xlu1 %612  ;;  %861 = vperm.xlu0 %1439, %v856_v49   ;;  %858 = vperm.xlu1 %1438, %v855_v57   ;;  %v711_v49 = vmul.f32 %v1739_v51, %v2001_v25  ;;  %v340_v57 = vmul.f32 0.015625, %v1907_v6  ;;  %v355_v6 = vmul.f32 0.015625, %v1899_v15  ;;  %v712_v15 = vmul.f32 %v1739_v51, %v1992_v32 }
 0x1e8   : > { %v616_v46 = vsub.f32 %v613_v43, %v604_v61  ;;  %v371_v43 = vsub.f32 %v1785_v29, %v339_v59 }
 0x1e9   : > { %v372_v10 = vsub.f32 %v1782_v28, %v340_v57  ;;  %v868_v28 = vshrl.u32 %v2274_v14, 7 }
 0x1eb   : > { %v404_v31 = vmul.f32 %v372_v10, %v372_v10 }
 0x1ec   : > { %v619_v3 = vpop.permute.xlu1 %618 }
 0x1ed   : > { %v629_v33 = vmul.f32 %v1744_v52, %v619_v3  ;;  %v466_v34 = vsel %vm227_vm0, %v404_v31, 0.0 }
 0x1ef   : > { %v631_v23 = vadd.f32 %v629_v33, %v615_v38  ;;  %v457_v38 = vsel %vm227_vm0, %v401_v60, 0.0 }
 0x1f0   : > { %v623_v19 = vpop.permute.xlu1 %622 }
 0x1f1   : > { %v630_v35 = vmul.f32 %v1744_v52, %v623_v19  ;;  %vm633_vm7 = vcmp.gt.f32.partialorder %v631_v23, 0.0  ;;  %vm635_vm10 = vcmp.lt.f32.partialorder %v631_v23, 0.0  ;;  %v418_v19 = vmul.f32 %v386_v27, %v386_v27 }
 0x1f3   : > { %v632_v5 = vadd.f32 %v630_v35, %v616_v46  ;;  %v508_v33 = vsel %vm227_vm0, %v418_v19, 0.0 }
 0x1f5   : > { %v674_v2 = vpop.permute.xlu1 %673  ;;  %vm634_vm13 = vcmp.gt.f32.partialorder %v632_v5, 0.0  ;;  %vm636_vm1 = vcmp.lt.f32.partialorder %v632_v5, 0.0 }
 0x1f6   : > { %v681_v9 = vsub.f32 %v674_v2, %v669_v4  ;;  %v387_v4 = vsub.f32 %v1795_v37, %v355_v6 }
 0x1f8   : > { %v419_v32 = vmul.f32 %v387_v4, %v387_v4 }
 0x1f9   : > { %v679_v7 = vpop.permute.xlu1 %678 }
 0x1fa   : > { %v682_v62 = vsub.f32 %v679_v7, %v670_v54  ;;  %v403_v7 = vmul.f32 %v371_v43, %v371_v43 }
 0x1fe   : > { %v685_v45 = vpop.permute.xlu1 %684 }
 0x1ff   : > { %v691_v50 = vmul.f32 %v1744_v52, %v685_v45  ;;  %v463_v45 = vsel %vm227_vm0, %v403_v7, 0.0 }
 0x201   : > { %v693_v22 = vadd.f32 %v691_v50, %v681_v9 }
 0x202   : > { %v689_v47 = vpop.permute.xlu1 %688 }
 0x203   : > { %vm695_vm8 = vcmp.gt.f32.partialorder %v693_v22, 0.0  ;;  %vm699_vm9 = vcmp.lt.f32.partialorder %v693_v22, 0.0  ;;  %v692_v30 = vmul.f32 %v1744_v52, %v689_v47  ;;  %v420_v47 = vmul.f32 %v388_v12, %v388_v12 }
 0x204   : > { %vm2028_vm11 = vmand %vm633_vm7, %vm695_vm8 }
 0x205   : > { %vm2032_vm12 = vmand %vm635_vm10, %vm699_vm9  ;;  %v694_v13 = vadd.f32 %v692_v30, %v682_v62  ;;  %v511_v30 = vsel %vm227_vm0, %v419_v32, 0.0  ;;  %v514_v17 = vsel %vm227_vm0, %v420_v47, 0.0 }
 0x206   : > { %461 = vadd.xlane.f32.xlu0 %v460_v1 }
 0x207   : > { %vm696_vm14 = vcmp.gt.f32.partialorder %v694_v13, 0.0  ;;  %vm700_vm15 = vcmp.lt.f32.partialorder %v694_v13, 0.0  ;;  %v745_v8 = vpop.permute.xlu1 %744 }
 0x208   : > { %vm2039_vm2 = vmand %vm634_vm13, %vm696_vm14  ;;  %v751_v62 = vmul.f32 %v1739_v51, %v745_v8 }
 0x209   : > { %vm2044_vm3 = vmand %vm636_vm1, %vm700_vm15 }
 0x20b   : > { %458 = vadd.xlane.f32.xlu1 %v457_v38 }
 0x20c   : > { %v715_v61 = vpop.permute.xlu1 %714 }
 0x20d   : > { %v721_v46 = vsub.f32 %v715_v61, %v711_v49  ;;  %v2056_v3 = vpop.xlane.xlu0 %446 }
 0x20e   : > { %v525_v40 = vmul.f32 0.015873017, %v2056_v3 }
 0x20f   : > { %v733_v2 = vadd.f32 %v731_v16, %v721_v46  ;;  %506 = vadd.xlane.f32.xlu1 %v505_v20 }
 0x210   : > { %v719_v25 = vpop.permute.xlu1 %718 }
 0x211   : > { %vm735_vm4 = vcmp.gt.f32.partialorder %v733_v2, 0.0  ;;  %vm739_vm5 = vcmp.lt.f32.partialorder %v733_v2, 0.0  ;;  %v495_v29 = vpop.xlane.xlu0 %494  ;;  %v722_v9 = vsub.f32 %v719_v25, %v712_v15 }
 0x212   : > { %vm2064_vm6 = vmand %vm2028_vm11, %vm735_vm4  ;;  %v541_v50 = vmul.f32 0.015873017, %v495_v29 }
 0x213   : > { %509 = vadd.xlane.f32.xlu1 %v508_v33  ;;  %vm2070_vm7 = vmand %vm2032_vm12, %vm739_vm5 }
 0x215   : > { %v729_v23 = vpop.permute.xlu1 %728  ;;  %v498_v35 = vpop.xlane.xlu0 %497 }
 0x216   : > { %v732_v54 = vmul.f32 %v1744_v52, %v729_v23  ;;  %v542_v22 = vmul.f32 0.015873017, %v498_v35 }
 0x217   : > { %464 = vadd.xlane.f32.xlu1 %v463_v45 }
 0x218   : > { %v734_v11 = vadd.f32 %v732_v54, %v722_v9  ;;  %v1347_v39 = vpack.c.bf16 %v542_v22, %v541_v50 }
 0x21a   : > { %vm736_vm8 = vcmp.gt.f32.partialorder %v734_v11, 0.0  ;;  %vm740_vm9 = vcmp.lt.f32.partialorder %v734_v11, 0.0  ;;  %v755_v37 = vpop.permute.xlu1 %754  ;;  %1348 = vmatpush3.bf16.msra.mxu1 %v1347_v39 }
 0x21b   : > { %467 = vadd.xlane.f32.xlu1 %v466_v34  ;;  %vm2084_vm10 = vmand %vm2039_vm2, %vm736_vm8  ;;  %1349 = vmatprep.subr.bf16.mxu1 %v1515_v26  ;;  %v761_v18 = vsub.f32 %v755_v37, %v751_v62 }
 0x21c   : > { %vm2091_vm11 = vmand %vm2044_vm3, %vm740_vm9 }
 0x21f   : > { %v765_v63 = vpop.permute.xlu1 %764  ;;  %512 = vadd.xlane.f32.xlu1 %v511_v30 }
 0x220   : > { %v771_v13 = vmul.f32 %v1744_v52, %v765_v63 }
 0x222   : > { %v773_v1 = vadd.f32 %v771_v13, %v761_v18 }
 0x223   : > { %v769_v42 = vpop.permute.xlu1 %768  ;;  %515 = vadd.xlane.f32.xlu1 %v514_v17 }
 0x224   : > { %vm775_vm12 = vcmp.gt.f32.partialorder %v773_v1, 0.0  ;;  %vm779_vm13 = vcmp.lt.f32.partialorder %v773_v1, 0.0  ;;  %v772_v60 = vmul.f32 %v1744_v52, %v769_v42 }
 0x225   : > { %vm2102_vm14 = vmand %vm2064_vm6, %vm775_vm12  ;;  %vm1524_vm6 = vmmov 0  }
 0x226   : > { %v774_v8 = vadd.f32 %v772_v60, %v762_v58  ;;  %vm2111_vm15 = vmand %vm2070_vm7, %vm779_vm13  ;;  %1272 = vmatprep.mubr.msk.f32.mxu0 %vm1524_vm6, %v1525_v48  ;;  %1307 = vmatprep.mubr.msk.f32.mxu1 %vm1524_vm6, %v1525_v48  ;;  %v846_v58 = vcvt.f32.s32 %v1974_v41  ;;  %v832_v41 = vcvt.f32.s32 %v1987_v24 }
 0x227   : > { %vm783_vm0 = vmor %vm2102_vm14, %vm2111_vm15 }
 0x228   : > { %vm776_vm1 = vcmp.gt.f32.partialorder %v774_v8, 0.0  ;;  %vm780_vm2 = vcmp.lt.f32.partialorder %v774_v8, 0.0  ;;  %v847_v38 = vshll.u32 %v846_v58, 16  ;;  %v833_v10 = vshll.u32 %v832_v41, 16 }
 0x229   : > { %vm2121_vm3 = vmand %vm2084_vm10, %vm776_vm1 }
 0x22a   : > { %vm2127_vm4 = vmand %vm2091_vm11, %vm780_vm2 }
 0x22b   : > { %vm784_vm5 = vmor %vm2121_vm3, %vm2127_vm4 }
 0x255   : > { %v450_v59 = vpop.xlane.xlu1 %449 }
 0x256   : > { %v526_v21 = vmul.f32 0.015873017, %v450_v59  ;;  %v844_v27 = vpop.xlane.xlu0 %843 }
 0x257   : > { %v845_v49 = vcvt.f32.s32 %v844_v27 }
 0x258   : > { %v1323_v57 = vpack.c.bf16 %v526_v21, %v525_v40 }
 0x259   : > { %v848_v61 = vadd.s32 %v847_v38, %v845_v49  ;;  %v453_v43 = vpop.xlane.xlu1 %452 }
 0x25a   : > { %v527_v16 = vmul.f32 0.015873017, %v453_v43  ;;  %1324 = vmatpush3.bf16.msra.mxu0 %v1323_v57  ;;  %v456_v46 = vpop.xlane.xlu0 %455 }
 0x25b   : > { %v528_v19 = vmul.f32 0.015873017, %v456_v46  ;;  %1325 = vmatprep.subr.bf16.mxu0 %v1515_v26  ;;  %vm850_vm7 = vcmp.eq.s32.totalorder %v1867_v56, %v848_v61 }
 0x25c   : > { %vm2147_vm8 = vmor %vm784_vm5, %vm850_vm7 }
 0x25d   : > { %v1326_v20 = vpack.c.bf16 %v528_v19, %v527_v16 }
 0x25e   : > { %v504_v7 = vpop.xlane.xlu0 %503 }
 0x25f   : > { %v830_v2 = vpop.xlane.xlu1 %829  ;;  %1327 = vmatpush3.bf16.msra.mxu0 %v1326_v20  ;;  %v544_v24 = vmul.f32 0.015873017, %v504_v7 }
 0x260   : > { %v831_v25 = vcvt.f32.s32 %v830_v2  ;;  %1328 = vmatprep.subr.bf16.mxu0 %v1515_v26 }
 0x262   : > { %v834_v6 = vadd.s32 %v833_v10, %v831_v25 }
 0x263   : > { %v501_v29 = vpop.xlane.xlu1 %500 }
 0x264   : > { %v543_v33 = vmul.f32 0.015873017, %v501_v29  ;;  %vm849_vm9 = vcmp.eq.s32.totalorder %v1867_v56, %v834_v6  ;;  %v1526_v6 = vmov 1.0  }
 0x265   : > { %vm851_vm10 = vmor %vm783_vm0, %vm849_vm9  ;;  %vm1073_vm9 = vcmask 7168  }
 0x266   : > { %v1350_v15 = vpack.c.bf16 %v544_v24, %v543_v33  ;;  %v862_v31 = vpop.permute.xlu0 %861 }
 0x267   : > { %vm864_vm11 = vcmp.eq.s32.totalorder %v862_v31, 1  ;;  %v859_v4 = vpop.permute.xlu1 %858 }
 0x268   : > { %vm866_vm12 = vmand %vm2147_vm8, %vm864_vm11  ;;  %vm863_vm13 = vcmp.eq.s32.totalorder %v859_v4, 1  ;;  %1351 = vmatpush3.bf16.msra.mxu1 %v1350_v15 }
 0x269   : > { %v870_v0 = vsel %vm866_vm12, 1, %v2247_v44  ;;  %v884_v23 = vsel %vm866_vm12, %v868_v28, 4294967295  ;;  %vm865_vm1 = vmand %vm851_vm10, %vm863_vm13  ;;  %1352 = vmatprep.subr.bf16.mxu1 %v1515_v26  ;;  %vm1099_vm12 = vcmp.eq.s32.totalorder %v1867_v56, 0  ;;  %vm1103_vm13 = vcmask 8192  }
 0x26a   : > { %v877_v35 = vrot.slane %v870_v0, 4  ;;  %v894_v45 = vrot.slane %v884_v23, 4  ;;  %v869_v9 = vsel %vm865_vm1, 1, %v2247_v44  ;;  %v883_v50 = vsel %vm865_vm1, %v868_v28, 4294967295 }
 0x26b   : > { %v871_v54 = vrot.slane %v869_v9, 4  ;;  %v885_v22 = vrot.slane %v883_v50, 4 }
 0x26c   : > { %v878_v11 = vadd.s32 %v877_v35, %v870_v0  ;;  %vm895_vm14 = vcmp.gt.s32.totalorder %v884_v23, %v894_v45 }
 0x26d   : > { %v896_v39 = vsel %vm895_vm14, %v884_v23, %v894_v45  ;;  %v872_v12 = vadd.s32 %v871_v54, %v869_v9  ;;  %vm886_vm15 = vcmp.gt.s32.totalorder %v883_v50, %v885_v22 }
 0x26e   : > { %v879_v32 = vrot.slane %v878_v11, 2  ;;  %v897_v37 = vrot.slane %v896_v39, 2  ;;  %v887_v34 = vsel %vm886_vm15, %v883_v50, %v885_v22 }
 0x26f   : > { %v873_v5 = vrot.slane %v872_v12, 2  ;;  %v888_v36 = vrot.slane %v887_v34, 2 }
 0x270   : > { %v880_v47 = vadd.s32 %v879_v32, %v878_v11  ;;  %vm898_vm0 = vcmp.gt.s32.totalorder %v896_v39, %v897_v37 }
 0x271   : > { %v874_v62 = vadd.s32 %v873_v5, %v872_v12  ;;  %vm889_vm2 = vcmp.gt.s32.totalorder %v887_v34, %v888_v36  ;;  %v899_v30 = vsel %vm898_vm0, %v896_v39, %v897_v37 }
 0x272   : > { %v881_v63 = vrot.slane %v880_v47, 1  ;;  %v900_v44 = vrot.slane %v899_v30, 1  ;;  %v890_v18 = vsel %vm889_vm2, %v887_v34, %v888_v36 }
 0x273   : > { %v875_v13 = vrot.slane %v874_v62, 1  ;;  %v891_v1 = vrot.slane %v890_v18, 1 }
 0x274   : > { %v882_v17 = vadd.s32 %v881_v63, %v880_v47  ;;  %vm901_vm3 = vcmp.gt.s32.totalorder %v899_v30, %v900_v44 }
 0x275   : > { %v876_v42 = vadd.s32 %v875_v13, %v874_v62  ;;  %vm892_vm4 = vcmp.gt.s32.totalorder %v890_v18, %v891_v1  ;;  %v902_v8 = vsel %vm901_vm3, %v899_v30, %v900_v44 }
 0x276   : > { %v904_v60 = vand.u32 1, %v882_v17  ;;  %v893_v52 = vsel %vm892_vm4, %v890_v18, %v891_v1 }
 0x277   : > { %v903_v51 = vand.u32 1, %v876_v42 }
 0x278   : > { %vm906_vm5 = vcmp.eq.s32.totalorder %v904_v60, 1 }
 0x279   : > { %v908_v53 = vsel %vm906_vm5, %v902_v8, 4294967295  ;;  %vm905_vm6 = vcmp.eq.s32.totalorder %v903_v51, 1 }
 0x27a   : > { %vm2164_vm7 = vcmp.eq.s32.totalorder %v908_v53, %v868_v28  ;;  %v907_v58 = vsel %vm905_vm6, %v893_v52, 4294967295 }
 0x27b   : > { %v1197_v59 = vsel %vm2164_vm7, 1.0, %v1525_v48  ;;  %vm2171_vm8 = vcmp.eq.s32.totalorder %v907_v58, %v868_v28 }
 0x27c   : > { %917 = vadd.xlane.f32.xlu0 %v1197_v59  ;;  %v1196_v21 = vsel %vm2171_vm8, 1.0, %v1525_v48 }
 0x27d   : > { %915 = vadd.xlane.f32.xlu1 %v1196_v21 }
 0x293   : > { %v462_v27 = vpop.xlane.xlu0 %461 }
 0x294   : > { %v530_v49 = vmul.f32 0.015873017, %v462_v27 }
 0x298   : > { %v459_v38 = vpop.xlane.xlu1 %458 }
 0x299   : > { %v529_v57 = vmul.f32 0.015873017, %v459_v38 }
 0x29b   : > { %v1329_v61 = vpack.c.bf16 %v530_v49, %v529_v57 }
 0x29c   : > { %v507_v43 = vpop.xlane.xlu1 %506 }
 0x29d   : > { %1330 = vmatpush3.bf16.msra.mxu0 %v1329_v61  ;;  %v545_v46 = vmul.f32 0.015873017, %v507_v43 }
 0x29e   : > { %1331 = vmatprep.subr.bf16.mxu0 %v1515_v26 }
 0x2a0   : > { %v510_v16 = vpop.xlane.xlu1 %509 }
 0x2a1   : > { %v546_v19 = vmul.f32 0.015873017, %v510_v16 }
 0x2a3   : > { %v1353_v41 = vpack.c.bf16 %v546_v19, %v545_v46 }
 0x2a4   : > { %v465_v3 = vpop.xlane.xlu1 %464 }
 0x2a5   : > { %1354 = vmatpush3.bf16.msra.mxu1 %v1353_v41  ;;  %v531_v2 = vmul.f32 0.015873017, %v465_v3 }
 0x2a6   : > { %1355 = vmatprep.subr.bf16.mxu1 %v1515_v26 }
 0x2a8   : > { %v468_v20 = vpop.xlane.xlu1 %467 }
 0x2a9   : > { %v532_v10 = vmul.f32 0.015873017, %v468_v20 }
 0x2ab   : > { %v1332_v25 = vpack.c.bf16 %v532_v10, %v531_v2 }
 0x2ac   : > { %v513_v7 = vpop.xlane.xlu1 %512 }
 0x2ad   : > { %1333 = vmatpush3.bf16.msra.mxu0 %v1332_v25  ;;  %v547_v24 = vmul.f32 0.015873017, %v513_v7 }
 0x2b0   : > { %1273 = vmatmul.mubr.msk.f32.vlgmr.msra.gmra.mrb[0].mxu0 %vm2171_vm8, %v1526_v6  ;;  %v516_v29 = vpop.xlane.xlu1 %515 }
 0x2b1   : > { %v548_v33 = vmul.f32 0.015873017, %v516_v29 }
 0x2b3   : > { %v1356_v14 = vpack.c.bf16 %v548_v33, %v547_v24 }
 0x2b5   : > { %1357 = vmatpush3.bf16.msra.mxu1 %v1356_v14 }
 0x2b8   : > { %1308 = vmatmul.mubr.msk.f32.vlgmr.msra.gmra.mrb[0].mxu1 %vm2164_vm7, %v1526_v6 }
 0x309   : > { %v918_v28 = vpop.xlane.xlu0 %917 }
 0x30a   : > { %vm1066_vm10 = vcmp.gt.f32.partialorder %v918_v28, 0.0  ;;  %v916_v26 = vpop.xlane.xlu1 %915  ;;  %v1060_v45 = vmax.f32 %v918_v28, 1.0 }
 0x30b   : > { %v1201_v15 = vsel %vm1066_vm10, 1.0, %v1525_v48  ;;  %vm1065_vm11 = vcmp.gt.f32.partialorder %v916_v26, 0.0  ;;  %v1059_v35 = vmax.f32 %v916_v26, 1.0 }
 0x30c   : > { %v1200_v31 = vsel %vm1065_vm11, 1.0, %v1525_v48  ;;  %v1088_v4 = vsel %vm1073_vm9, %v1201_v15, 0.0 }
 0x30d   : > { %v1087_v0 = vsel %vm1073_vm9, %v1200_v31, 0.0  ;;  %1440 = vrcp.f32 %v1059_v35 }
 0x30e   : > { %v1089_v23 = vadd.f32 %v1088_v4, %v1087_v0  ;;  %1442 = vrcp.f32 %v1060_v45 }
 0x310   : > { %1090 = vadd.xlane.f32.xlu0 %v1089_v23 }
 0x317   : > { %v1441_v54 = vpop.eup %1440 }
 0x318   : > { %v1443_v11 = vpop.eup %1442 }
 0x383   : > { %v985_v9 = vpop.f32.mrb[0].mxu0 }
 0x384   : > { %v1274_v50 = vpop.f32.mrb[1].mxu0  ;;  %v1062_v22 = vmul.f32 %v1441_v54, %v985_v9 }
 0x386   : > { %v1071_v12 = vmul.f32 %v1200_v31, %v1062_v22 }
 0x388   : > { %v1074_v34 = vsel %vm1073_vm9, %v1071_v12, 0.0 }
 0x38b   : > { %v1055_v39 = vpop.f32.mrb[0].mxu1 }
 0x38c   : > { %v1064_v32 = vmul.f32 %v1443_v11, %v1055_v39  ;;  %v1309_v37 = vpop.f32.mrb[1].mxu1 }
 0x38e   : > { %v1072_v48 = vmul.f32 %v1201_v15, %v1064_v32 }
 0x390   : > { %v1075_v5 = vsel %vm1073_vm9, %v1072_v48, 0.0 }
 0x391   : > { %v1076_v36 = vadd.f32 %v1075_v5, %v1074_v34 }
 0x393   : > { %1077 = vadd.xlane.f32.xlu1 %v1076_v36 }
 0x39d   : > { %v1091_v47 = vpop.xlane.xlu0 %1090 }
 0x39e   : > { %v1092_v62 = vrot.slane %v1091_v47, 4 }
 0x3a0   : > { %v1093_v30 = vadd.f32 %v1092_v62, %v1091_v47 }
 0x3a2   : > { %v1094_v63 = vrot.slane %v1093_v30, 2 }
 0x3a4   : > { %v1095_v1 = vadd.f32 %v1094_v63, %v1093_v30 }
 0x3a6   : > { %v1096_v60 = vrot.slane %v1095_v1, 1 }
 0x3a8   : > { %v1097_v53 = vadd.f32 %v1096_v60, %v1095_v1 }
 0x420   : > { %v1078_v44 = vpop.xlane.xlu1 %1077 }
 0x421   : > { %v1079_v18 = vrot.slane %v1078_v44, 4 }
 0x423   : > { %v1080_v13 = vadd.f32 %v1079_v18, %v1078_v44 }
 0x425   : > { %v1081_v17 = vrot.slane %v1080_v13, 2 }
 0x427   : > { %v1082_v42 = vadd.f32 %v1081_v17, %v1080_v13 }
 0x429   : > { %v1083_v51 = vrot.slane %v1082_v42, 1 }
 0x42b   : > { %v1084_v8 = vadd.f32 %v1083_v51, %v1082_v42 }
 0x42d   : > { %1358 = vpush %v1084_v8 }
 0x42e   : > { %1360 = vpush %v1097_v53 }
 0x45e   : > { %s1359_s25 = spop %1358 }
 0x45f   : > { %s1086_s28 = ssub.f32 0.0, %s1359_s25  ;;  %s1361_s29 = spop %1360 }
 0x460   : > { %v1101_v55 = vstv %s1361_s29 }
 0x461   : > { %v1100_v52 = vstv %s1086_s28 }
 0x462   : > { %v1102_v58 = vsel %vm1099_vm12, %v1100_v52, %v1101_v55 }
 0x463   : > { %1104 = vst.msk [vmem:[%s181_s26] sm:$0x1] %vm1103_vm13, %v1102_v58 }
 0x464   : > { %1457 = shalt.err (!%p1454_p3)
}
 0x465   : > { %s1458_s10 = scalar_lea.hbm %s2196_s5, 16  ;;  %s1462_s19 = scalar_lea.hbm %s2241_s3, 32 }
 0x466   : > { %p1459_p4 = scmp.ne.s32.totalorder %s2196_s5, %s1458_s10  ;;  %p1463_p9 = scmp.lt.u32.totalorder %s2196_s5, %s2241_s3 }
 0x467   : > { %p1464_p10 = scmp.lt.u32.totalorder %s1462_s19, %s1458_s10  ;;  %p1466_p12 = scmp.lt.u32.totalorder %s1458_s10, %s2196_s5 }
 0x468   : > { %p1460_p7 = pnand %p1459_p4, %p1586_p5 }
 0x469   : > { %p1465_p11 = por %p1464_p10, %p1463_p9 }
 0x46a   : > { %p1461_p8 = pneg %p1460_p7 }
 0x46b   : > { %p1467_p13 = por %p1466_p12, %p1465_p11 }
 0x46d   : > { %p1468_p0 = pnand %p1467_p13, %p1461_p8 }
 0x46f   : > { %1471 = shalt.err (!%p1468_p0)
}
 0x470   : > { %1362 = dma.vmem_to_hbm [thread:$0]  (%p1586_p5), %s2198_s27, 16, %s2196_s5, %s1106_s16  }
 0x471 PF: > { %p1368_p1 = scmp.ge.s32.totalorder %s1506_s15, 2  ;;  %s1130_s25 = sand.u32 1, %s1494_s12  }
 0x472   : > { %s1131_s26 = scalar_lea.sflag [#allocation3], %s1130_s25 }
 0x473   : > { %p1365_p2 = pnand %p1368_p1, %p1590_p6 }
 0x475   : > { %1489 = dma.done.wait (!%p1365_p2), %s1131_s26, 16  }
 0x476   : > { %1491 = vsyncadd (!%p1365_p2), %s1131_s26, 4294967280  ;;  %p13_p3 = scmp.ge.s32.totalorder %s1573_s18, 4   ;;  %s2279_s12 = smov %s1498_s13 }
 0x477   : > { %s2280_s13 = smov %s1502_s14  ;;  %s2281_s14 = smov %s1584_s21 }
 0x478   : > { %s2282_s15 = smov %s1573_s18  ;;  %15 = sbr.rel (!%p13_p3) target bundleno = 3 (0x3), region = 70 }
 0x47f   :  { %1135 = vsyncpa [#allocation3], 1 }
 0x480   :  { %1137 = vsyncpa [#allocation3 + $0x1], 1 }

</bundles_post_ra>
